<compile_context>
chip_gen: v5e
topology: v5e:2x2
jax: 0.10.0
libtpu: 0.0.40
codegen_flags: <defaults>
</compile_context>

<pallas_src>
import numpy as np
import jax
import jax.numpy as jnp
from jax.experimental import pallas as pl
from jax.experimental.pallas import tpu as pltpu


def _res_block_kernel(x_ref, m1_ref, m2_ref, b2_ref, msc_ref,
                      gamma_ref, beta_ref, g_ref, mask_ref, o_ref):
    NH = x_ref.shape[0]
    eps = 1e-5

    # Hoisted loads, reused by all three conv / BN applications.
    gmat = g_ref[...]             # (W*Cout, W*Cout) channel group-mean matrix
    gamma = gamma_ref[...]        # (1, W*Cout) lane-tiled
    beta = beta_ref[...]          # (1, W*Cout) lane-tiled
    b2 = b2_ref[...]              # (1, W*Cout) lane-tiled conv2 bias
    mask_up = mask_ref[:, 0:1]    # (NH,1): 0 at h == 0,    else 1
    mask_dn = mask_ref[:, 1:2]    # (NH,1): 0 at h == H-1,  else 1

    def conv3x3(a, m_ref, bias):
        # 3x3 conv as three accumulating MXU matmuls against the kh = 0/1/2
        # row blocks of the folded weight (W-axis taps + padding pre-encoded).
        # Row shifts via XLU sublane roll + boundary mask (no buffer copies);
        # shifts never leak across the image boundary thanks to the mask.
        up = pltpu.roll(a, shift=1, axis=0) * mask_up       # row h-1
        dn = pltpu.roll(a, shift=NH - 1, axis=0) * mask_dn  # row h+1
        y = jnp.dot(up, m_ref[0], preferred_element_type=jnp.float32)
        y = y + jnp.dot(a, m_ref[1], preferred_element_type=jnp.float32)
        y = y + jnp.dot(dn, m_ref[2], preferred_element_type=jnp.float32)
        return y if bias is None else y + bias

    def bn_relu(y):
        # Single-pass batch statistics: sum and sum-of-squares together, then
        # one (2, WCO) @ (WCO, WCO) matmul sums over the W copies of each
        # channel, divides by N*H*W (folded into gmat) and re-broadcasts the
        # per-channel value to every (w, c) lane.
        stats = jnp.concatenate(
            [jnp.sum(y, axis=0, keepdims=True),
             jnp.sum(y * y, axis=0, keepdims=True)], axis=0)       # (2, WCO)
        red = jnp.dot(stats, gmat, preferred_element_type=jnp.float32)
        mean = red[0:1, :]                                         # E[y]
        var = red[1:2, :] - mean * mean                            # biased var
        scale = gamma * jax.lax.rsqrt(var + eps)
        shift = beta - mean * scale
        return jnp.maximum(y * scale + shift, 0.0)

    x = x_ref[...]                                  # (NH, W*CP), ones lane set

    # out = relu(bn(conv1(x)))     (conv1 bias folded into m1[1] via ones lane)
    out = bn_relu(conv3x3(x, m1_ref, None))
    # out = relu(bn(conv2(out)))
    out = bn_relu(conv3x3(out, m2_ref, b2))
    # out = relu(bn(conv2(out)))   (same conv2 / bn weights, applied again)
    out = bn_relu(conv3x3(out, m2_ref, b2))

    # skip = self_conv(x): 1x1 conv == block-diagonal matmul; bsc folded via
    # the ones lane of x.
    skip = jnp.dot(x, msc_ref[...], preferred_element_type=jnp.float32)

    o_ref[...] = out + skip


def _fold_conv3x3_split(w_hwio, W_, cin_pack, bias=None, ones_row=None):
    """Fold a (3,3,Cin,Cout) HWIO kernel into a (3, W*cin_pack, W*Cout) stack
    of per-kh matrices so the 3x3 conv on the lane-packed (N*H, W*C) layout is
    three accumulating matmuls (h-1 / h / h+1).  W-axis taps and W zero
    padding are encoded in the matrix; padded input channels get zero rows.
    If `bias` is given it is folded into the kh=1 block at row `ones_row`
    (the constant-1 lane of the activation)."""
    w = np.asarray(w_hwio, np.float32)
    cin, cout = w.shape[2], w.shape[3]
    m = np.zeros((3, W_ * cin_pack, W_ * cout), np.float32)
    for kh in range(3):
        for kw in range(3):
            for wo in range(W_):
                wi = wo + kw - 1
                if 0 <= wi < W_:
                    r0 = wi * cin_pack
                    m[kh, r0:r0 + cin, wo * cout:(wo + 1) * cout] = w[kh, kw]
    if bias is not None:
        b = np.asarray(bias, np.float32).reshape(cout)
        for wo in range(W_):
            m[1, ones_row, wo * cout:(wo + 1) * cout] = b
    return jnp.asarray(m)


def _fold_conv1x1(wsc, bsc, W_, cin_pack, ones_row):
    """Block-diagonal (W*cin_pack, W*Cout) matrix for the 1x1 skip conv on the
    lane-packed layout, with the bias folded in at row `ones_row`."""
    wsc = np.asarray(wsc, np.float32)
    cin, cout = wsc.shape
    m = np.zeros((W_ * cin_pack, W_ * cout), np.float32)
    for wo in range(W_):
        m[wo * cin_pack: wo * cin_pack + cin,
          wo * cout:(wo + 1) * cout] = wsc
    b = np.asarray(bsc, np.float32).reshape(cout)
    for wo in range(W_):
        m[ones_row, wo * cout:(wo + 1) * cout] = b
    return jnp.asarray(m)


def res_block_forward(x_nchw, params):
    N, Cin, H, W = x_nchw.shape
    Cout = params["w1"].shape[-1]
    CP = 8                       # padded input-channel count (lane-dense)
    assert Cin < CP, "need a spare padded channel to carry the bias ones-lane"
    NH = N * H
    ONE = CP - 1                 # lane index (w=0, c=CP-1) of the constant-1 lane

    # NCHW -> lane-packed (N*H, W*CP): zero-pad channels, set the ones lane.
    x = jnp.transpose(x_nchw, (0, 2, 3, 1)).astype(jnp.float32)   # (N,H,W,Cin)
    x = jnp.pad(x, ((0, 0), (0, 0), (0, 0), (0, CP - Cin)))       # (N,H,W,CP)
    x = x.reshape(NH, W * CP).at[:, ONE].set(1.0)

    # Folded weights (built once, host-side).
    m1 = _fold_conv3x3_split(params["w1"], W, CP,
                             bias=params["b1"], ones_row=ONE)   # (3, W*CP,  W*Cout)
    m2 = _fold_conv3x3_split(params["w2"], W, Cout)             # (3, W*Cout, W*Cout)
    msc = _fold_conv1x1(params["wsc"], params["bsc"], W, CP, ONE)
    # Per-channel group-mean matrix: sums over the W copies of each channel and
    # divides by the full pixel count, so the kernel gets E[.] directly.
    g = jnp.asarray(np.kron(np.ones((W, W), np.float32),
                            np.eye(Cout, dtype=np.float32)) / float(N * H * W))

    def lane_tile(v):  # (1, Cout) -> (1, W*Cout) with lane index w*Cout + c
        return jnp.tile(jnp.asarray(v, jnp.float32).reshape(1, Cout), (1, W))

    # Boundary masks for the sublane rolls (0 at image top / bottom rows).
    h_idx = np.arange(NH) % H
    mask = jnp.asarray(np.stack([(h_idx != 0), (h_idx != H - 1)],
                                axis=1).astype(np.float32))        # (NH, 2)

    out_flat = pl.pallas_call(
        _res_block_kernel,
        out_shape=jax.ShapeDtypeStruct((NH, W * Cout), jnp.float32),
        in_specs=[pl.BlockSpec(memory_space=pltpu.MemorySpace.VMEM)] * 9,
        out_specs=pl.BlockSpec(memory_space=pltpu.MemorySpace.VMEM),
    )(x, m1, m2, lane_tile(params["b2"]), msc,
      lane_tile(params["gamma"]), lane_tile(params["beta"]), g, mask)

    # lane-packed (N*H, W*Cout) -> NCHW
    return jnp.transpose(out_flat.reshape(N, H, W, Cout), (0, 3, 1, 2))


def reference_forward(x_nchw, p):
    """Pure-JAX reference of the PyTorch forward (train-mode BN)."""
    x = jnp.transpose(x_nchw, (0, 2, 3, 1)).astype(jnp.float32)

    def conv(y, w, b, pad):
        z = jax.lax.conv_general_dilated(
            y, w, window_strides=(1, 1), padding=[(pad, pad), (pad, pad)],
            dimension_numbers=("NHWC", "HWIO", "NHWC"))
        return z + b.reshape(1, 1, 1, -1)

    def bn_relu(y):
        mean = y.mean(axis=(0, 1, 2), keepdims=True)
        var = ((y - mean) ** 2).mean(axis=(0, 1, 2), keepdims=True)
        yh = (y - mean) / jnp.sqrt(var + 1e-5)
        return jnp.maximum(yh * p["gamma"].reshape(1, 1, 1, -1)
                           + p["beta"].reshape(1, 1, 1, -1), 0.0)

    out = bn_relu(conv(x, p["w1"], p["b1"], 1))
    out = bn_relu(conv(out, p["w2"], p["b2"], 1))
    out = bn_relu(conv(out, p["w2"], p["b2"], 1))
    skip = jnp.einsum("nhwc,cd->nhwd", x, p["wsc"]) + p["bsc"].reshape(1, 1, 1, -1)
    return jnp.transpose(out + skip, (0, 3, 1, 2))


def init_params(key, cin, cout):
    # Deterministic synthetic init (kaiming-like scale for convs,
    # gamma=1 / beta=0 matching PyTorch BatchNorm2d defaults).
    ks = jax.random.split(key, 6)
    fan_out_3 = 9 * cout
    return {
        "w1": jax.random.normal(ks[0], (3, 3, cin, cout), jnp.float32)
              * np.sqrt(2.0 / fan_out_3),
        "b1": 0.1 * jax.random.normal(ks[1], (1, cout), jnp.float32),
        "w2": jax.random.normal(ks[2], (3, 3, cout, cout), jnp.float32)
              * np.sqrt(2.0 / fan_out_3),
        "b2": 0.1 * jax.random.normal(ks[3], (1, cout), jnp.float32),
        "wsc": jax.random.normal(ks[4], (cin, cout), jnp.float32)
               * np.sqrt(2.0 / cout),
        "bsc": 0.1 * jax.random.normal(ks[5], (1, cout), jnp.float32),
        "gamma": jnp.ones((1, cout), jnp.float32),
        "beta": jnp.zeros((1, cout), jnp.float32),
    }


if __name__ == "__main__":
    key = jax.random.PRNGKey(0)
    kx, kp = jax.random.split(key)
    N, Cin, H, W, Cout = 2, 4, 16, 16, 8
    x = jax.random.normal(kx, (N, Cin, H, W), jnp.float32)   # PyTorch NCHW input
    params = init_params(kp, Cin, Cout)

    y = jax.block_until_ready(res_block_forward(x, params))
    y_ref = jax.block_until_ready(reference_forward(x, params))

    assert y.shape == (N, Cout, H, W)
    max_err = float(np.max(np.abs(np.asarray(y) - np.asarray(y_ref))))
    assert np.allclose(np.asarray(y), np.asarray(y_ref), atol=1e-3, rtol=1e-3), max_err
    print("KERNEL_OK")
</pallas_src>

<mosaic_0001>
module attributes {stable_mosaic.version = 11 : i64} {
  func.func @_res_block_kernel(%arg0: memref<32x128xf32, #tpu.memory_space<vmem>>, %arg1: memref<3x128x128xf32, #tpu.memory_space<vmem>>, %arg2: memref<3x128x128xf32, #tpu.memory_space<vmem>>, %arg3: memref<1x128xf32, #tpu.memory_space<vmem>>, %arg4: memref<128x128xf32, #tpu.memory_space<vmem>>, %arg5: memref<1x128xf32, #tpu.memory_space<vmem>>, %arg6: memref<1x128xf32, #tpu.memory_space<vmem>>, %arg7: memref<128x128xf32, #tpu.memory_space<vmem>>, %arg8: memref<32x2xf32, #tpu.memory_space<vmem>>, %arg9: memref<32x128xf32, #tpu.memory_space<vmem>>) attributes {dimension_semantics = [], scalar_prefetch = 0 : i64, scratch_operands = 0 : i64, tpu.core_type = #tpu.core_type<tc>} {
    %c0 = arith.constant 0 : index
    %c0_0 = arith.constant 0 : index
    %0 = vector.load %arg7[%c0, %c0_0] : memref<128x128xf32, #tpu.memory_space<vmem>>, vector<128x128xf32>
    %c0_1 = arith.constant 0 : index
    %c0_2 = arith.constant 0 : index
    %1 = vector.load %arg5[%c0_1, %c0_2] : memref<1x128xf32, #tpu.memory_space<vmem>>, vector<1x128xf32>
    %c0_3 = arith.constant 0 : index
    %c0_4 = arith.constant 0 : index
    %2 = vector.load %arg6[%c0_3, %c0_4] : memref<1x128xf32, #tpu.memory_space<vmem>>, vector<1x128xf32>
    %c0_5 = arith.constant 0 : index
    %c0_6 = arith.constant 0 : index
    %3 = vector.load %arg3[%c0_5, %c0_6] : memref<1x128xf32, #tpu.memory_space<vmem>>, vector<1x128xf32>
    %c0_7 = arith.constant 0 : index
    %c0_8 = arith.constant 0 : index
    %4 = vector.load %arg8[%c0_7, %c0_8] : memref<32x2xf32, #tpu.memory_space<vmem>>, vector<32x1xf32>
    %c0_9 = arith.constant 0 : index
    %c1 = arith.constant 1 : index
    %5 = vector.load %arg8[%c0_9, %c1] : memref<32x2xf32, #tpu.memory_space<vmem>>, vector<32x1xf32>
    %c0_10 = arith.constant 0 : index
    %c0_11 = arith.constant 0 : index
    %6 = vector.load %arg0[%c0_10, %c0_11] : memref<32x128xf32, #tpu.memory_space<vmem>>, vector<32x128xf32>
    %c1_i32 = arith.constant 1 : i32
    %7 = tpu.dynamic_rotate %6 by %c1_i32 dim 0 : vector<32x128xf32>, i32 -> vector<32x128xf32>
    %8 = vector.broadcast %4 : vector<32x1xf32> to vector<32x128xf32>
    %9 = arith.mulf %7, %8 : vector<32x128xf32>
    %c31_i32 = arith.constant 31 : i32
    %10 = tpu.dynamic_rotate %6 by %c31_i32 dim 0 : vector<32x128xf32>, i32 -> vector<32x128xf32>
    %11 = vector.broadcast %5 : vector<32x1xf32> to vector<32x128xf32>
    %12 = arith.mulf %10, %11 : vector<32x128xf32>
    %c0_12 = arith.constant 0 : index
    %c0_13 = arith.constant 0 : index
    %c0_14 = arith.constant 0 : index
    %13 = vector.load %arg1[%c0_12, %c0_13, %c0_14] : memref<3x128x128xf32, #tpu.memory_space<vmem>>, vector<1x128x128xf32>
    %14 = vector.shape_cast %13 : vector<1x128x128xf32> to vector<128x128xf32>
    %cst = arith.constant dense<0.000000e+00> : vector<32x128xf32>
    %15 = tpu.matmul %9, %14, %cst {dimension_numbers = #tpu.dot_dimension_numbers<[1], [0], [0], [1], [0, 0, 1, 1], [], []>} : vector<32x128xf32>, vector<128x128xf32>, vector<32x128xf32> -> vector<32x128xf32>
    %c1_15 = arith.constant 1 : index
    %c0_16 = arith.constant 0 : index
    %c0_17 = arith.constant 0 : index
    %16 = vector.load %arg1[%c1_15, %c0_16, %c0_17] : memref<3x128x128xf32, #tpu.memory_space<vmem>>, vector<1x128x128xf32>
    %17 = vector.shape_cast %16 : vector<1x128x128xf32> to vector<128x128xf32>
    %cst_18 = arith.constant dense<0.000000e+00> : vector<32x128xf32>
    %18 = tpu.matmul %6, %17, %cst_18 {dimension_numbers = #tpu.dot_dimension_numbers<[1], [0], [0], [1], [0, 0, 1, 1], [], []>} : vector<32x128xf32>, vector<128x128xf32>, vector<32x128xf32> -> vector<32x128xf32>
    %19 = arith.addf %15, %18 : vector<32x128xf32>
    %c2 = arith.constant 2 : index
    %c0_19 = arith.constant 0 : index
    %c0_20 = arith.constant 0 : index
    %20 = vector.load %arg1[%c2, %c0_19, %c0_20] : memref<3x128x128xf32, #tpu.memory_space<vmem>>, vector<1x128x128xf32>
    %21 = vector.shape_cast %20 : vector<1x128x128xf32> to vector<128x128xf32>
    %cst_21 = arith.constant dense<0.000000e+00> : vector<32x128xf32>
    %22 = tpu.matmul %12, %21, %cst_21 {dimension_numbers = #tpu.dot_dimension_numbers<[1], [0], [0], [1], [0, 0, 1, 1], [], []>} : vector<32x128xf32>, vector<128x128xf32>, vector<32x128xf32> -> vector<32x128xf32>
    %23 = arith.addf %19, %22 : vector<32x128xf32>
    %cst_22 = arith.constant dense<0.000000e+00> : vector<128xf32>
    %24 = vector.multi_reduction <add>, %23, %cst_22 [0] : vector<32x128xf32> to vector<128xf32>
    %25 = vector.shape_cast %24 : vector<128xf32> to vector<1x128xf32>
    %26 = arith.mulf %23, %23 : vector<32x128xf32>
    %cst_23 = arith.constant dense<0.000000e+00> : vector<128xf32>
    %27 = vector.multi_reduction <add>, %26, %cst_23 [0] : vector<32x128xf32> to vector<128xf32>
    %28 = vector.shape_cast %27 : vector<128xf32> to vector<1x128xf32>
    %29 = tpu.concatenate %25, %28 in 0 : vector<1x128xf32>, vector<1x128xf32> -> vector<2x128xf32>
    %cst_24 = arith.constant dense<0.000000e+00> : vector<2x128xf32>
    %30 = tpu.matmul %29, %0, %cst_24 {dimension_numbers = #tpu.dot_dimension_numbers<[1], [0], [0], [1], [0, 0, 1, 1], [], []>} : vector<2x128xf32>, vector<128x128xf32>, vector<2x128xf32> -> vector<2x128xf32>
    %31 = vector.extract_strided_slice %30 {offsets = [0, 0], sizes = [1, 128], strides = [1, 1]} : vector<2x128xf32> to vector<1x128xf32>
    %32 = vector.extract_strided_slice %30 {offsets = [1, 0], sizes = [1, 128], strides = [1, 1]} : vector<2x128xf32> to vector<1x128xf32>
    %33 = arith.mulf %31, %31 : vector<1x128xf32>
    %34 = arith.subf %32, %33 : vector<1x128xf32>
    %cst_25 = arith.constant 9.99999974E-6 : f32
    %35 = vector.broadcast %cst_25 : f32 to vector<1x128xf32>
    %36 = arith.addf %34, %35 : vector<1x128xf32>
    %37 = math.rsqrt %36 : vector<1x128xf32>
    %38 = arith.mulf %1, %37 : vector<1x128xf32>
    %39 = arith.mulf %31, %38 : vector<1x128xf32>
    %40 = arith.subf %2, %39 : vector<1x128xf32>
    %41 = vector.broadcast %38 : vector<1x128xf32> to vector<32x128xf32>
    %42 = arith.mulf %23, %41 : vector<32x128xf32>
    %43 = vector.broadcast %40 : vector<1x128xf32> to vector<32x128xf32>
    %44 = arith.addf %42, %43 : vector<32x128xf32>
    %cst_26 = arith.constant 0.000000e+00 : f32
    %45 = vector.broadcast %cst_26 : f32 to vector<32x128xf32>
    %46 = arith.maximumf %44, %45 : vector<32x128xf32>
    %c1_i32_27 = arith.constant 1 : i32
    %47 = tpu.dynamic_rotate %46 by %c1_i32_27 dim 0 : vector<32x128xf32>, i32 -> vector<32x128xf32>
    %48 = vector.broadcast %4 : vector<32x1xf32> to vector<32x128xf32>
    %49 = arith.mulf %47, %48 : vector<32x128xf32>
    %c31_i32_28 = arith.constant 31 : i32
    %50 = tpu.dynamic_rotate %46 by %c31_i32_28 dim 0 : vector<32x128xf32>, i32 -> vector<32x128xf32>
    %51 = vector.broadcast %5 : vector<32x1xf32> to vector<32x128xf32>
    %52 = arith.mulf %50, %51 : vector<32x128xf32>
    %c0_29 = arith.constant 0 : index
    %c0_30 = arith.constant 0 : index
    %c0_31 = arith.constant 0 : index
    %53 = vector.load %arg2[%c0_29, %c0_30, %c0_31] : memref<3x128x128xf32, #tpu.memory_space<vmem>>, vector<1x128x128xf32>
    %54 = vector.shape_cast %53 : vector<1x128x128xf32> to vector<128x128xf32>
    %cst_32 = arith.constant dense<0.000000e+00> : vector<32x128xf32>
    %55 = tpu.matmul %49, %54, %cst_32 {dimension_numbers = #tpu.dot_dimension_numbers<[1], [0], [0], [1], [0, 0, 1, 1], [], []>} : vector<32x128xf32>, vector<128x128xf32>, vector<32x128xf32> -> vector<32x128xf32>
    %c1_33 = arith.constant 1 : index
    %c0_34 = arith.constant 0 : index
    %c0_35 = arith.constant 0 : index
    %56 = vector.load %arg2[%c1_33, %c0_34, %c0_35] : memref<3x128x128xf32, #tpu.memory_space<vmem>>, vector<1x128x128xf32>
    %57 = vector.shape_cast %56 : vector<1x128x128xf32> to vector<128x128xf32>
    %cst_36 = arith.constant dense<0.000000e+00> : vector<32x128xf32>
    %58 = tpu.matmul %46, %57, %cst_36 {dimension_numbers = #tpu.dot_dimension_numbers<[1], [0], [0], [1], [0, 0, 1, 1], [], []>} : vector<32x128xf32>, vector<128x128xf32>, vector<32x128xf32> -> vector<32x128xf32>
    %59 = arith.addf %55, %58 : vector<32x128xf32>
    %c2_37 = arith.constant 2 : index
    %c0_38 = arith.constant 0 : index
    %c0_39 = arith.constant 0 : index
    %60 = vector.load %arg2[%c2_37, %c0_38, %c0_39] : memref<3x128x128xf32, #tpu.memory_space<vmem>>, vector<1x128x128xf32>
    %61 = vector.shape_cast %60 : vector<1x128x128xf32> to vector<128x128xf32>
    %cst_40 = arith.constant dense<0.000000e+00> : vector<32x128xf32>
    %62 = tpu.matmul %52, %61, %cst_40 {dimension_numbers = #tpu.dot_dimension_numbers<[1], [0], [0], [1], [0, 0, 1, 1], [], []>} : vector<32x128xf32>, vector<128x128xf32>, vector<32x128xf32> -> vector<32x128xf32>
    %63 = arith.addf %59, %62 : vector<32x128xf32>
    %64 = vector.broadcast %3 : vector<1x128xf32> to vector<32x128xf32>
    %65 = arith.addf %63, %64 : vector<32x128xf32>
    %cst_41 = arith.constant dense<0.000000e+00> : vector<128xf32>
    %66 = vector.multi_reduction <add>, %65, %cst_41 [0] : vector<32x128xf32> to vector<128xf32>
    %67 = vector.shape_cast %66 : vector<128xf32> to vector<1x128xf32>
    %68 = arith.mulf %65, %65 : vector<32x128xf32>
    %cst_42 = arith.constant dense<0.000000e+00> : vector<128xf32>
    %69 = vector.multi_reduction <add>, %68, %cst_42 [0] : vector<32x128xf32> to vector<128xf32>
    %70 = vector.shape_cast %69 : vector<128xf32> to vector<1x128xf32>
    %71 = tpu.concatenate %67, %70 in 0 : vector<1x128xf32>, vector<1x128xf32> -> vector<2x128xf32>
    %cst_43 = arith.constant dense<0.000000e+00> : vector<2x128xf32>
    %72 = tpu.matmul %71, %0, %cst_43 {dimension_numbers = #tpu.dot_dimension_numbers<[1], [0], [0], [1], [0, 0, 1, 1], [], []>} : vector<2x128xf32>, vector<128x128xf32>, vector<2x128xf32> -> vector<2x128xf32>
    %73 = vector.extract_strided_slice %72 {offsets = [0, 0], sizes = [1, 128], strides = [1, 1]} : vector<2x128xf32> to vector<1x128xf32>
    %74 = vector.extract_strided_slice %72 {offsets = [1, 0], sizes = [1, 128], strides = [1, 1]} : vector<2x128xf32> to vector<1x128xf32>
    %75 = arith.mulf %73, %73 : vector<1x128xf32>
    %76 = arith.subf %74, %75 : vector<1x128xf32>
    %cst_44 = arith.constant 9.99999974E-6 : f32
    %77 = vector.broadcast %cst_44 : f32 to vector<1x128xf32>
    %78 = arith.addf %76, %77 : vector<1x128xf32>
    %79 = math.rsqrt %78 : vector<1x128xf32>
    %80 = arith.mulf %1, %79 : vector<1x128xf32>
    %81 = arith.mulf %73, %80 : vector<1x128xf32>
    %82 = arith.subf %2, %81 : vector<1x128xf32>
    %83 = vector.broadcast %80 : vector<1x128xf32> to vector<32x128xf32>
    %84 = arith.mulf %65, %83 : vector<32x128xf32>
    %85 = vector.broadcast %82 : vector<1x128xf32> to vector<32x128xf32>
    %86 = arith.addf %84, %85 : vector<32x128xf32>
    %cst_45 = arith.constant 0.000000e+00 : f32
    %87 = vector.broadcast %cst_45 : f32 to vector<32x128xf32>
    %88 = arith.maximumf %86, %87 : vector<32x128xf32>
    %c1_i32_46 = arith.constant 1 : i32
    %89 = tpu.dynamic_rotate %88 by %c1_i32_46 dim 0 : vector<32x128xf32>, i32 -> vector<32x128xf32>
    %90 = vector.broadcast %4 : vector<32x1xf32> to vector<32x128xf32>
    %91 = arith.mulf %89, %90 : vector<32x128xf32>
    %c31_i32_47 = arith.constant 31 : i32
    %92 = tpu.dynamic_rotate %88 by %c31_i32_47 dim 0 : vector<32x128xf32>, i32 -> vector<32x128xf32>
    %93 = vector.broadcast %5 : vector<32x1xf32> to vector<32x128xf32>
    %94 = arith.mulf %92, %93 : vector<32x128xf32>
    %c0_48 = arith.constant 0 : index
    %c0_49 = arith.constant 0 : index
    %c0_50 = arith.constant 0 : index
    %95 = vector.load %arg2[%c0_48, %c0_49, %c0_50] : memref<3x128x128xf32, #tpu.memory_space<vmem>>, vector<1x128x128xf32>
    %96 = vector.shape_cast %95 : vector<1x128x128xf32> to vector<128x128xf32>
    %cst_51 = arith.constant dense<0.000000e+00> : vector<32x128xf32>
    %97 = tpu.matmul %91, %96, %cst_51 {dimension_numbers = #tpu.dot_dimension_numbers<[1], [0], [0], [1], [0, 0, 1, 1], [], []>} : vector<32x128xf32>, vector<128x128xf32>, vector<32x128xf32> -> vector<32x128xf32>
    %c1_52 = arith.constant 1 : index
    %c0_53 = arith.constant 0 : index
    %c0_54 = arith.constant 0 : index
    %98 = vector.load %arg2[%c1_52, %c0_53, %c0_54] : memref<3x128x128xf32, #tpu.memory_space<vmem>>, vector<1x128x128xf32>
    %99 = vector.shape_cast %98 : vector<1x128x128xf32> to vector<128x128xf32>
    %cst_55 = arith.constant dense<0.000000e+00> : vector<32x128xf32>
    %100 = tpu.matmul %88, %99, %cst_55 {dimension_numbers = #tpu.dot_dimension_numbers<[1], [0], [0], [1], [0, 0, 1, 1], [], []>} : vector<32x128xf32>, vector<128x128xf32>, vector<32x128xf32> -> vector<32x128xf32>
    %101 = arith.addf %97, %100 : vector<32x128xf32>
    %c2_56 = arith.constant 2 : index
    %c0_57 = arith.constant 0 : index
    %c0_58 = arith.constant 0 : index
    %102 = vector.load %arg2[%c2_56, %c0_57, %c0_58] : memref<3x128x128xf32, #tpu.memory_space<vmem>>, vector<1x128x128xf32>
    %103 = vector.shape_cast %102 : vector<1x128x128xf32> to vector<128x128xf32>
    %cst_59 = arith.constant dense<0.000000e+00> : vector<32x128xf32>
    %104 = tpu.matmul %94, %103, %cst_59 {dimension_numbers = #tpu.dot_dimension_numbers<[1], [0], [0], [1], [0, 0, 1, 1], [], []>} : vector<32x128xf32>, vector<128x128xf32>, vector<32x128xf32> -> vector<32x128xf32>
    %105 = arith.addf %101, %104 : vector<32x128xf32>
    %106 = vector.broadcast %3 : vector<1x128xf32> to vector<32x128xf32>
    %107 = arith.addf %105, %106 : vector<32x128xf32>
    %cst_60 = arith.constant dense<0.000000e+00> : vector<128xf32>
    %108 = vector.multi_reduction <add>, %107, %cst_60 [0] : vector<32x128xf32> to vector<128xf32>
    %109 = vector.shape_cast %108 : vector<128xf32> to vector<1x128xf32>
    %110 = arith.mulf %107, %107 : vector<32x128xf32>
    %cst_61 = arith.constant dense<0.000000e+00> : vector<128xf32>
    %111 = vector.multi_reduction <add>, %110, %cst_61 [0] : vector<32x128xf32> to vector<128xf32>
    %112 = vector.shape_cast %111 : vector<128xf32> to vector<1x128xf32>
    %113 = tpu.concatenate %109, %112 in 0 : vector<1x128xf32>, vector<1x128xf32> -> vector<2x128xf32>
    %cst_62 = arith.constant dense<0.000000e+00> : vector<2x128xf32>
    %114 = tpu.matmul %113, %0, %cst_62 {dimension_numbers = #tpu.dot_dimension_numbers<[1], [0], [0], [1], [0, 0, 1, 1], [], []>} : vector<2x128xf32>, vector<128x128xf32>, vector<2x128xf32> -> vector<2x128xf32>
    %115 = vector.extract_strided_slice %114 {offsets = [0, 0], sizes = [1, 128], strides = [1, 1]} : vector<2x128xf32> to vector<1x128xf32>
    %116 = vector.extract_strided_slice %114 {offsets = [1, 0], sizes = [1, 128], strides = [1, 1]} : vector<2x128xf32> to vector<1x128xf32>
    %117 = arith.mulf %115, %115 : vector<1x128xf32>
    %118 = arith.subf %116, %117 : vector<1x128xf32>
    %cst_63 = arith.constant 9.99999974E-6 : f32
    %119 = vector.broadcast %cst_63 : f32 to vector<1x128xf32>
    %120 = arith.addf %118, %119 : vector<1x128xf32>
    %121 = math.rsqrt %120 : vector<1x128xf32>
    %122 = arith.mulf %1, %121 : vector<1x128xf32>
    %123 = arith.mulf %115, %122 : vector<1x128xf32>
    %124 = arith.subf %2, %123 : vector<1x128xf32>
    %125 = vector.broadcast %122 : vector<1x128xf32> to vector<32x128xf32>
    %126 = arith.mulf %107, %125 : vector<32x128xf32>
    %127 = vector.broadcast %124 : vector<1x128xf32> to vector<32x128xf32>
    %128 = arith.addf %126, %127 : vector<32x128xf32>
    %cst_64 = arith.constant 0.000000e+00 : f32
    %129 = vector.broadcast %cst_64 : f32 to vector<32x128xf32>
    %130 = arith.maximumf %128, %129 : vector<32x128xf32>
    %c0_65 = arith.constant 0 : index
    %c0_66 = arith.constant 0 : index
    %131 = vector.load %arg4[%c0_65, %c0_66] : memref<128x128xf32, #tpu.memory_space<vmem>>, vector<128x128xf32>
    %cst_67 = arith.constant dense<0.000000e+00> : vector<32x128xf32>
    %132 = tpu.matmul %6, %131, %cst_67 {dimension_numbers = #tpu.dot_dimension_numbers<[1], [0], [0], [1], [0, 0, 1, 1], [], []>} : vector<32x128xf32>, vector<128x128xf32>, vector<32x128xf32> -> vector<32x128xf32>
    %133 = arith.addf %130, %132 : vector<32x128xf32>
    %c0_68 = arith.constant 0 : index
    %c0_69 = arith.constant 0 : index
    %134 = vector.load %arg9[%c0_68, %c0_69] : memref<32x128xf32, #tpu.memory_space<vmem>>, vector<32x128xf32>
    tpu.vector_store %arg9[%c0_68, %c0_69], %133 {strides = array<i32>} : memref<32x128xf32, #tpu.memory_space<vmem>>, vector<32x128xf32>,
    return
  }
}

</mosaic_0001>

<bundles_post_ra>
// kernel: tpu_custom_call.1
= control target key start
LH: loop header
LB: loop body
LE: loop exit
PB: predicated region body
PF: predicated region fallthrough
CT: control target
= control target key end

     0   :  { %14 = vsyncpa [#allocation3], 0  ;;  %s1685_s0 = inlined_call_operand.vmem [shape: f32[32,128], index: 0, kind: input, shape index: {}]   ;;  %s1686_s1 = inlined_call_operand.hbm [shape: f32[3,128,128], index: 1, kind: input, shape index: {}]   ;;  %s1687_s2 = inlined_call_operand.hbm [shape: f32[3,128,128], index: 2, kind: input, shape index: {}]   ;;  %s1688_s3 = inlined_call_operand.vmem [shape: f32[1,128], index: 3, kind: input, shape index: {}]   ;;  %s1689_s4 = inlined_call_operand.hbm [shape: f32[128,128], index: 4, kind: input, shape index: {}]   ;;  %s1690_s5 = inlined_call_operand.vmem [shape: f32[1,128], index: 5, kind: input, shape index: {}]   ;;  %s1691_s6 = inlined_call_operand.vmem [shape: f32[1,128], index: 6, kind: input, shape index: {}]   ;;  %s1692_s7 = inlined_call_operand.hbm [shape: f32[128,128], index: 7, kind: input, shape index: {}]   ;;  %s1693_s8 = inlined_call_operand.vmem [shape: f32[32,2], index: 8, kind: input, shape index: {}]   ;;  %s1694_s9 = inlined_call_operand.hbm [shape: f32[32,128], index: 9, kind: output, shape index: {}]  }
   0x1   :  { %15 = vsyncpa [#allocation6], 0 }
   0x2   :  { %16 = vsyncpa [#allocation9], 0 }
   0x3   :  { %17 = vsyncpa [#allocation4], 0  ;;  %s37_s11 = sshll.u32 %s1687_s2, 4  ;;  %s1105_s12 = smov [#allocation5]   ;;  %s38_s11 = int_to_ptr.hbm [resolvable:$true] %s37_s11 }
   0x4   :  { %s39_s13 = sshll.u32 %s1105_s12, 4  ;;  %s24_s16 = sshll.u32 %s1686_s1, 4  ;;  %s40_s13 = int_to_ptr.vmem [resolvable:$true] %s39_s13  ;;  %s25_s16 = int_to_ptr.hbm [resolvable:$true] %s24_s16 }
   0x5   :  { %s1106_s17 = smov 128   ;;  %s1107_s18 = smov 8  }
   0x6   :  { %45 = dma.hbm_to_vmem [thread:$0]  %s38_s11, 6144, %s40_s13, [#allocation6], %s1106_s17, %s1106_s17, %s1107_s18  }
   0x7   :  { %s1108_s19 = smov [#allocation2]   ;;  %s52_s2 = sshll.u32 %s1689_s4, 4  ;;  %s53_s2 = int_to_ptr.hbm [resolvable:$true] %s52_s2 }
   0x8   :  { %s26_s20 = sshll.u32 %s1108_s19, 4  ;;  %s69_s24 = sshll.u32 %s1692_s7, 4  ;;  %s27_s20 = int_to_ptr.vmem [resolvable:$true] %s26_s20  ;;  %s70_s24 = int_to_ptr.hbm [resolvable:$true] %s69_s24 }
   0x9   :  { %32 = dma.hbm_to_vmem [thread:$0]  %s25_s16, 6144, %s27_s20, [#allocation3], %s1106_s17, %s1106_s17, %s1107_s18  }
   0xa   :  { %s1109_s25 = smov [#allocation7]   ;;  %s1110_s27 = smov [#allocation8]  }
   0xb   :  { %s54_s26 = sshll.u32 %s1109_s25, 4  ;;  %s71_s4 = sshll.u32 %s1110_s27, 4  ;;  %s55_s26 = int_to_ptr.vmem [resolvable:$true] %s54_s26  ;;  %s72_s4 = int_to_ptr.vmem [resolvable:$true] %s71_s4 }
   0xc   :  { %60 = dma.hbm_to_vmem [thread:$0]  %s53_s2, 2048, %s55_s26, [#allocation6], %s1106_s17, %s1106_s17, %s1107_s18  }
   0xd   :  { %77 = dma.hbm_to_vmem [thread:$0]  %s70_s24, 2048, %s72_s4, [#allocation9], %s1106_s17, %s1106_s17, %s1107_s18  }
   0xe   :  { %1097 = dma.done.wait [#allocation3], 6144  }
   0xf   :  { %1098 = vsyncadd [#allocation3], 4294961152 }
  0x10   :  { %1099 = dma.done.wait [#allocation6], 8192  }
  0x11   :  { %1100 = vsyncadd [#allocation6], 4294959104 }
  0x12   :  { %1101 = dma.done.wait [#allocation9], 2048  }
  0x13   :  { %1102 = vsyncadd [#allocation9], 4294965248  ;;  %v1111_v0 = vmov 1   ;;  %v115_v1 = vld [vmem:[%s1693_s8] sm:$0xff]  ;;  %v116_v2 = vld [vmem:[%s1693_s8 + $0x8] sm:$0xff]  ;;  %v1112_v14 = vmov 0   ;;  %v127_v56 = vlaneseq }
  0x14   :  { %958 = vset.pattern.permute.xlu0 %v1111_v0  ;;  %960 = vset.pattern.permute.xlu1 %v1111_v0  ;;  %v117_v3 = vld [vmem:[%s1693_s8 + $0x10] sm:$0xff]  ;;  %v294_v4 = vld [vmem:[#allocation2 + $0x178] sm:$0xff]  ;;  %v293_v5 = vld [vmem:[#allocation2 + $0x170] sm:$0xff]  ;;  %vm350_vm2 = vcmask 1040384   ;;  %s934_s12 = sshll.u32 %s1694_s9, 4  ;;  %s935_s12 = int_to_ptr.hbm [resolvable:$true] %s934_s12 }
  0x15   :  { %962 = vset.pattern.permute.xlu2 %v1111_v0  ;;  %168 = vperm.xlu0 %958, %v115_v1   ;;  %v219_v6 = vld [vmem:[#allocation2 + $0xf8] sm:$0xff]  ;;  %v218_v7 = vld [vmem:[#allocation2 + $0xf0] sm:$0xff]  ;;  %v292_v8 = vld [vmem:[#allocation2 + $0x168] sm:$0xff]  ;;  %v1214_v58 = vshrl.u32 %v127_v56, 7 }
  0x16   :  { %172 = vperm.xlu1 %960, %v116_v2   ;;  %176 = vperm.xlu2 %962, %v117_v3   ;;  %v217_v9 = vld [vmem:[#allocation2 + $0xe8] sm:$0xff]  ;;  %v202_v10 = vld [vmem:[#allocation2 + $0x78] sm:$0xff]  ;;  %v291_v11 = vld [vmem:[#allocation2 + $0x160] sm:$0xff] }
  0x17   :  { %295 = vmatpush.msra.mxu2 %v294_v4  ;;  %220 = vmatpush.msra.mxu3 %v219_v6  ;;  %v201_v12 = vld [vmem:[#allocation2 + $0x70] sm:$0xff]  ;;  %v290_v13 = vld [vmem:[#allocation2 + $0x158] sm:$0xff]  ;;  %v216_v15 = vld [vmem:[#allocation2 + $0xe0] sm:$0xff]  ;;  %vm162_vm0 = vcmp.lt.s32.totalorder %v1214_v58, 7  ;;  %vm129_vm1 = vcmp.lt.s32.totalorder %v1214_v58, 1 }
  0x18   :  { %249 = vmatpush.msra.mxu1 %v202_v10  ;;  %v289_v16 = vld [vmem:[#allocation2 + $0x150] sm:$0xff]  ;;  %v200_v17 = vld [vmem:[#allocation2 + $0x68] sm:$0xff]  ;;  %v215_v18 = vld [vmem:[#allocation2 + $0xd8] sm:$0xff] }
  0x19   :  { %296 = vmatpush.msra.mxu2 %v293_v5  ;;  %221 = vmatpush.msra.mxu3 %v218_v7  ;;  %v288_v19 = vld [vmem:[#allocation2 + $0x148] sm:$0xff]  ;;  %v199_v20 = vld [vmem:[#allocation2 + $0x60] sm:$0xff]  ;;  %v214_v21 = vld [vmem:[#allocation2 + $0xd0] sm:$0xff] }
  0x1a   :  { %250 = vmatpush.msra.mxu1 %v201_v12  ;;  %v287_v22 = vld [vmem:[#allocation2 + $0x140] sm:$0xff]  ;;  %v198_v23 = vld [vmem:[#allocation2 + $0x58] sm:$0xff]  ;;  %v213_v24 = vld [vmem:[#allocation2 + $0xc8] sm:$0xff] }
  0x1b   :  { %297 = vmatpush.msra.mxu2 %v292_v8  ;;  %222 = vmatpush.msra.mxu3 %v217_v9  ;;  %v118_v25 = vld [vmem:[%s1693_s8 + $0x18] sm:$0xff]  ;;  %v286_v26 = vld [vmem:[#allocation2 + $0x138] sm:$0xff]  ;;  %v212_v27 = vld [vmem:[#allocation2 + $0xc0] sm:$0xff] }
  0x1c   :  { %251 = vmatpush.msra.mxu1 %v200_v17  ;;  %v285_v28 = vld [vmem:[#allocation2 + $0x130] sm:$0xff]  ;;  %v211_v30 = vld [vmem:[#allocation2 + $0xb8] sm:$0xff]  ;;  %v284_v31 = vld [vmem:[#allocation2 + $0x128] sm:$0xff] }
  0x1d   :  { %298 = vmatpush.msra.mxu2 %v291_v11  ;;  %959 = vset.pattern.permute.xlu0 %v1112_v14  ;;  %v197_v29 = vld [vmem:[#allocation2 + $0x50] sm:$0xff]  ;;  %v196_v32 = vld [vmem:[#allocation2 + $0x48] sm:$0xff]  ;;  %v283_v34 = vld [vmem:[#allocation2 + $0x120] sm:$0xff] }
  0x1e   :  { %961 = vset.pattern.permute.xlu1 %v1112_v14  ;;  %136 = vperm.xlu0 %959, %v115_v1   ;;  %v210_v33 = vld [vmem:[#allocation2 + $0xb0] sm:$0xff]  ;;  %v195_v35 = vld [vmem:[#allocation2 + $0x40] sm:$0xff]  ;;  %v209_v36 = vld [vmem:[#allocation2 + $0xa8] sm:$0xff] }
  0x1f   :  { %141 = vperm.xlu1 %961, %v116_v2   ;;  %963 = vset.pattern.permute.xlu2 %v1112_v14  ;;  %v282_v37 = vld [vmem:[#allocation2 + $0x118] sm:$0xff]  ;;  %v208_v39 = vld [vmem:[#allocation2 + $0xa0] sm:$0xff]  ;;  %v281_v40 = vld [vmem:[#allocation2 + $0x110] sm:$0xff] }
  0x20   :  { %299 = vmatpush.msra.mxu2 %v290_v13  ;;  %146 = vperm.xlu2 %963, %v117_v3   ;;  %v194_v38 = vld [vmem:[#allocation2 + $0x38] sm:$0xff]  ;;  %v193_v41 = vld [vmem:[#allocation2 + $0x30] sm:$0xff]  ;;  %v280_v43 = vld [vmem:[#allocation2 + $0x108] sm:$0xff] }
  0x21   :  { %223 = vmatpush.msra.mxu3 %v216_v15  ;;  %252 = vmatpush.msra.mxu1 %v199_v20  ;;  %v207_v42 = vld [vmem:[#allocation2 + $0x98] sm:$0xff]  ;;  %v206_v44 = vld [vmem:[#allocation2 + $0x90] sm:$0xff]  ;;  %v192_v45 = vld [vmem:[#allocation2 + $0x28] sm:$0xff] }
  0x22   :  { %300 = vmatpush.msra.mxu2 %v289_v16  ;;  %v279_v46 = vld [vmem:[#allocation2 + $0x100] sm:$0xff]  ;;  %v205_v47 = vld [vmem:[#allocation2 + $0x88] sm:$0xff]  ;;  %v190_v50 = vld [vmem:[#allocation2 + $0x18] sm:$0xff] }
  0x23   :  { %224 = vmatpush.msra.mxu3 %v215_v18  ;;  %253 = vmatpush.msra.mxu1 %v198_v23  ;;  %v191_v48 = vld [vmem:[#allocation2 + $0x20] sm:$0xff]  ;;  %v189_v51 = vld [vmem:[#allocation2 + $0x10] sm:$0xff]  ;;  %v119_v52 = vld [vmem:[%s1685_s0] sm:$0xff] }
  0x24   :  { %301 = vmatpush.msra.mxu2 %v288_v19  ;;  %v204_v49 = vld [vmem:[#allocation2 + $0x80] sm:$0xff]  ;;  %v188_v53 = vld [vmem:[#allocation2 + $0x8] sm:$0xff]  ;;  %v158_v59 = vrot.slane %v119_v52, 1  ;;  %v122_v61 = vld [vmem:[%s1685_s0 + $0x18] sm:$0xff]  ;;  %v123_v3 = vrot.slane %v119_v52, 7 }
  0x25   :  { %225 = vmatpush.msra.mxu3 %v214_v21  ;;  %254 = vmatpush.msra.mxu1 %v197_v29  ;;  %v187_v54 = vld [vmem:[#allocation2] sm:$0xff]  ;;  %v121_v57 = vld [vmem:[%s1685_s0 + $0x10] sm:$0xff]  ;;  %v126_v4 = vrot.slane %v122_v61, 7  ;;  %v161_v8 = vrot.slane %v122_v61, 1  ;;  %v1264_v29 = vld [vmem:[#allocation8 + $0x70] sm:$0xff] }
  0x26   :  { %302 = vmatpush.msra.mxu2 %v287_v22  ;;  %965 = vset.pattern.permute.xlu0 %v1111_v0  ;;  %v120_v55 = vld [vmem:[%s1685_s0 + $0x8] sm:$0xff]  ;;  %v125_v18 = vrot.slane %v121_v57, 7 }
  0x27   :  { %964 = vset.pattern.permute.xlu1 %v1111_v0  ;;  %226 = vmatpush.msra.mxu3 %v213_v24  ;;  %v159_v60 = vrot.slane %v120_v55, 1  ;;  %v160_v0 = vrot.slane %v121_v57, 1  ;;  %v133_v7 = vsel %vm129_vm1, %v126_v4, %v123_v3  ;;  %v124_v10 = vrot.slane %v120_v55, 7 }
  0x28   :  { %180 = vperm.xlu1 %964, %v118_v25   ;;  %303 = vmatpush.msra.mxu2 %v286_v26  ;;  %v166_v20 = vsel %vm162_vm0, %v161_v8, %v158_v59  ;;  %v130_v26 = vsel %vm129_vm1, %v125_v18, %v126_v4 }
  0x29   :  { %151 = vperm.xlu2 %963, %v118_v25   ;;  %227 = vmatpush.msra.mxu3 %v212_v27  ;;  %v165_v62 = vsel %vm162_vm0, %v158_v59, %v159_v60  ;;  %v164_v5 = vsel %vm162_vm0, %v159_v60, %v160_v0  ;;  %v163_v14 = vsel %vm162_vm0, %v160_v0, %v161_v8 }
  0x2a   :  { %304 = vmatpush.msra.mxu2 %v285_v28  ;;  %255 = vmatpush.msra.mxu1 %v196_v32  ;;  %v132_v15 = vsel %vm129_vm1, %v123_v3, %v124_v10  ;;  %v131_v22 = vsel %vm129_vm1, %v124_v10, %v125_v18  ;;  %v1261_v28 = vld [vmem:[#allocation8 + $0x78] sm:$0xff] }
  0x2b   :  { %228 = vmatpush.msra.mxu3 %v211_v30  ;;  %v1267_v30 = vld [vmem:[#allocation8 + $0x68] sm:$0xff]  ;;  %v1273_v32 = vld [vmem:[#allocation8 + $0x58] sm:$0xff] }
  0x2c   :  { %305 = vmatpush.msra.mxu2 %v284_v31  ;;  %256 = vmatpush.msra.mxu1 %v195_v35  ;;  %v1270_v31 = vld [vmem:[#allocation8 + $0x60] sm:$0xff]  ;;  %v1279_v35 = vld [vmem:[#allocation8 + $0x48] sm:$0xff] }
  0x2d   :  { %229 = vmatpush.msra.mxu3 %v210_v33 }
  0x2e   :  { %306 = vmatpush.msra.mxu2 %v283_v34  ;;  %257 = vmatpush.msra.mxu1 %v194_v38  ;;  %v1276_v34 = vld [vmem:[#allocation8 + $0x50] sm:$0xff]  ;;  %v1285_v38 = vld [vmem:[#allocation8 + $0x38] sm:$0xff] }
  0x2f   :  { %230 = vmatpush.msra.mxu3 %v209_v36  ;;  %v1282_v36 = vld [vmem:[#allocation8 + $0x40] sm:$0xff] }
  0x30   :  { %307 = vmatpush.msra.mxu2 %v282_v37  ;;  %258 = vmatpush.msra.mxu1 %v193_v41 }
  0x31   :  { %231 = vmatpush.msra.mxu3 %v208_v39 }
  0x32   :  { %308 = vmatpush.msra.mxu2 %v281_v40  ;;  %259 = vmatpush.msra.mxu1 %v192_v45  ;;  %v1288_v40 = vld [vmem:[#allocation8 + $0x30] sm:$0xff] }
  0x33   :  { %232 = vmatpush.msra.mxu3 %v207_v42  ;;  %v1291_v42 = vld [vmem:[#allocation8 + $0x28] sm:$0xff] }
  0x34   :  { %309 = vmatpush.msra.mxu2 %v280_v43  ;;  %260 = vmatpush.msra.mxu1 %v191_v48  ;;  %v1294_v43 = vld [vmem:[#allocation8 + $0x20] sm:$0xff]  ;;  %v1302_v48 = vld [vmem:[#allocation8 + $0x8] sm:$0xff] }
  0x35   :  { %233 = vmatpush.msra.mxu3 %v206_v44  ;;  %v1296_v44 = vld [vmem:[#allocation8 + $0x18] sm:$0xff] }
  0x36   :  { %310 = vmatpush.msra.mxu2 %v279_v46  ;;  %261 = vmatpush.msra.mxu1 %v190_v50  ;;  %v1299_v46 = vld [vmem:[#allocation8 + $0x10] sm:$0xff] }
  0x37   :  { %234 = vmatpush.msra.mxu3 %v205_v47 }
  0x38   :  { %262 = vmatpush.msra.mxu1 %v189_v51 }
  0x39   :  { %235 = vmatpush.msra.mxu3 %v204_v49  ;;  %v1305_v49 = vld [vmem:[#allocation8] sm:$0xff] }
  0x3a   :  { %236 = vmatmul.f32.vlgmr.msra.gmra.mxu3 %v119_v52  ;;  %263 = vmatpush.msra.mxu1 %v188_v53 }
  0x3b   :  { %352 = vmatpush.msrb.mxu3 %v1261_v28 }
  0x3c   :  { %264 = vmatpush.msra.mxu1 %v187_v54 }
  0x3d   :  { %353 = vmatpush.msrb.mxu3 %v1264_v29 }
  0x3f   :  { %354 = vmatpush.msrb.mxu3 %v1267_v30 }
  0x41   :  { %355 = vmatpush.msrb.mxu3 %v1270_v31 }
  0x42   :  { %239 = vmatmul.f32.gmra.mxu3 %v120_v55 }
  0x43   :  { %356 = vmatpush.msrb.mxu3 %v1273_v32 }
  0x45   :  { %357 = vmatpush.msrb.mxu3 %v1276_v34 }
  0x47   :  { %358 = vmatpush.msrb.mxu3 %v1279_v35 }
  0x49   :  { %359 = vmatpush.msrb.mxu3 %v1282_v36 }
  0x4a   :  { %242 = vmatmul.f32.gmra.mxu3 %v121_v57 }
  0x4b   :  { %360 = vmatpush.msrb.mxu3 %v1285_v38 }
  0x4d   :  { %361 = vmatpush.msrb.mxu3 %v1288_v40 }
  0x4f   :  { %362 = vmatpush.msrb.mxu3 %v1291_v42 }
  0x51   :  { %363 = vmatpush.msrb.mxu3 %v1294_v43 }
  0x52   :  { %245 = vmatmul.f32.gmra.mxu3 %v122_v61 }
  0x53   :  { %364 = vmatpush.msrb.mxu3 %v1296_v44 }
  0x55   :  { %365 = vmatpush.msrb.mxu3 %v1299_v46 }
  0x57   :  { %366 = vmatpush.msrb.mxu3 %v1302_v48 }
  0x59   :  { %367 = vmatpush.msrb.mxu3 %v1305_v49 }
  0x5b   :  { %609 = vmatpush.msra.mxu3 %v1261_v28 }
  0x5d   :  { %610 = vmatpush.msra.mxu3 %v1264_v29 }
  0x5f   :  { %611 = vmatpush.msra.mxu3 %v1267_v30 }
  0x61   :  { %612 = vmatpush.msra.mxu3 %v1270_v31 }
  0x63   :  { %613 = vmatpush.msra.mxu3 %v1273_v32 }
  0x65   :  { %614 = vmatpush.msra.mxu3 %v1276_v34 }
  0x67   :  { %615 = vmatpush.msra.mxu3 %v1279_v35 }
  0x69   :  { %616 = vmatpush.msra.mxu3 %v1282_v36 }
  0x6b   :  { %617 = vmatpush.msra.mxu3 %v1285_v38 }
  0x6d   :  { %618 = vmatpush.msra.mxu3 %v1288_v40 }
  0x6f   :  { %619 = vmatpush.msra.mxu3 %v1291_v42 }
  0x70   :  { %v1236_v12 = vpop.permute.xlu2 %176 }
  0x71   :  { %1703 = vst [vmem:[#allocation15_spill] sm:$0xff] %v1236_v12  ;;  %v185_v16 = vmul.f32 %v1236_v12, %v163_v14  ;;  %620 = vmatpush.msra.mxu3 %v1294_v43 }
  0x73   :  { %621 = vmatpush.msra.mxu3 %v1296_v44 }
  0x75   :  { %622 = vmatpush.msra.mxu3 %v1299_v46 }
  0x77   :  { %623 = vmatpush.msra.mxu3 %v1302_v48 }
  0x79   :  { %624 = vmatpush.msra.mxu3 %v1305_v49 }
  0x7a   :  { %v1250_v21 = vpop.permute.xlu2 %146 }
  0x7b   :  { %1705 = vst [vmem:[#allocation17_spill] sm:$0xff] %v1250_v21  ;;  %v156_v24 = vmul.f32 %v1250_v21, %v131_v22 }
  0x83   :  { %v1256_v25 = vpop.permute.xlu2 %151 }
  0x84   :  { %1706 = vst [vmem:[#allocation18_spill] sm:$0xff] %v1256_v25  ;;  %v157_v27 = vmul.f32 %v1256_v25, %v130_v26 }
  0x87   :  { %v1222_v63 = vpop.permute.xlu0 %168 }
  0x88   :  { %v183_v1 = vmul.f32 %v1222_v63, %v165_v62  ;;  %v1225_v2 = vpop.permute.xlu1 %172 }
  0x89   :  { %v184_v6 = vmul.f32 %v1225_v2, %v164_v5 }
  0x8a   :  { %311 = vmatmul.f32.vlgmr.msra.gmra.mxu2 %v183_v1 }
  0x90   :  { %v1233_v9 = vpop.permute.xlu0 %136 }
  0x91   :  { %v154_v11 = vmul.f32 %v1233_v9, %v133_v7  ;;  %v1238_v13 = vpop.permute.xlu1 %141 }
  0x92   :  { %314 = vmatmul.f32.gmra.mxu2 %v184_v6  ;;  %v155_v17 = vmul.f32 %v1238_v13, %v132_v15 }
  0x93   :  { %265 = vmatmul.f32.vlgmr.msra.gmra.mxu1 %v154_v11 }
  0x9a   :  { %317 = vmatmul.f32.gmra.mxu2 %v185_v16  ;;  %v1246_v19 = vpop.permute.xlu1 %180 }
  0x9b   :  { %268 = vmatmul.f32.gmra.mxu1 %v155_v17  ;;  %1704 = vst [vmem:[#allocation16_spill] sm:$0xff] %v1246_v19  ;;  %v186_v23 = vmul.f32 %v1246_v19, %v166_v20  ;;  %v1505_v19 = vld [vmem:[#allocation5] sm:$0xff] }
  0xa2   :  { %320 = vmatmul.f32.gmra.mxu2 %v186_v23 }
  0xa3   :  { %271 = vmatmul.f32.gmra.mxu1 %v156_v24 }
  0xab   :  { %274 = vmatmul.f32.gmra.mxu1 %v157_v27 }
  0xbd   :  { %v237_v33 = vpop.f32.mrf.mxu3 }
  0xc5   :  { %v240_v41 = vpop.f32.mrf.mxu3 }
  0xcd   :  { %v243_v50 = vpop.f32.mrf.mxu3 }
  0xd5   :  { %v246_v60 = vpop.f32.mrf.mxu3 }
 0x10d   :  { %v312_v37 = vpop.f32.mrf.mxu2 }
 0x110   :  { %v266_v39 = vpop.f32.mrf.mxu1 }
 0x111   :  { %v267_v54 = vadd.f32 %v266_v39, %v237_v33 }
 0x113   :  { %v1315_v57 = vadd.f32 %v312_v37, %v267_v54  ;;  %v1427_v54 = vld [vmem:[#allocation5 + $0x148] sm:$0xff] }
 0x115   :  { %v315_v45 = vpop.f32.mrf.mxu2  ;;  %v337_v1 = vmul.f32 %v1315_v57, %v1315_v57 }
 0x118   :  { %v269_v47 = vpop.f32.mrf.mxu1 }
 0x119   :  { %v270_v51 = vadd.f32 %v269_v47, %v240_v41  ;;  %v1407_v47 = vld [vmem:[#allocation5 + $0x158] sm:$0xff] }
 0x11b   :  { %v1312_v56 = vadd.f32 %v315_v45, %v270_v51  ;;  %v1400_v45 = vld [vmem:[#allocation5 + $0x60] sm:$0xff]  ;;  %v1418_v51 = vld [vmem:[#allocation5 + $0x50] sm:$0xff] }
 0x11d   :  { %v318_v52 = vpop.f32.mrf.mxu2  ;;  %v338_v61 = vmul.f32 %v1312_v56, %v1312_v56  ;;  %v328_v3 = vadd.f32 %v1312_v56, %v1315_v57 }
 0x11f   :  { %v341_v6 = vadd.f32 %v338_v61, %v337_v1  ;;  %v1435_v61 = vld [vmem:[#allocation5 + $0xb0] sm:$0xff] }
 0x120   :  { %v272_v53 = vpop.f32.mrf.mxu1 }
 0x121   :  { %v273_v55 = vadd.f32 %v272_v53, %v243_v50  ;;  %v1416_v50 = vld [vmem:[#allocation5 + $0x150] sm:$0xff] }
 0x123   :  { %v1317_v59 = vadd.f32 %v318_v52, %v273_v55  ;;  %v1422_v52 = vld [vmem:[#allocation5 + $0xb8] sm:$0xff]  ;;  %v1429_v55 = vld [vmem:[#allocation5 + $0x48] sm:$0xff] }
 0x125   :  { %v321_v0 = vpop.f32.mrf.mxu2  ;;  %v339_v4 = vmul.f32 %v1317_v59, %v1317_v59  ;;  %v329_v8 = vadd.f32 %v328_v3, %v1317_v59  ;;  %v1444_v3 = vld [vmem:[#allocation5 + $0xa8] sm:$0xff] }
 0x127   :  { %v342_v14 = vadd.f32 %v341_v6, %v339_v4  ;;  %v1447_v4 = vld [vmem:[#allocation5 + $0x138] sm:$0xff] }
 0x128   :  { %v275_v62 = vpop.f32.mrf.mxu1 }
 0x129   :  { %v276_v5 = vadd.f32 %v275_v62, %v246_v60  ;;  %v1438_v62 = vld [vmem:[#allocation5 + $0x140] sm:$0xff] }
 0x12b   :  { %v1330_v7 = vadd.f32 %v321_v0, %v276_v5  ;;  %v1440_v0 = vld [vmem:[#allocation5 + $0x40] sm:$0xff]  ;;  %v1449_v5 = vld [vmem:[#allocation5 + $0x38] sm:$0xff] }
 0x12d   :  { %v330_v10 = vadd.f32 %v329_v8, %v1330_v7  ;;  %v340_v11 = vmul.f32 %v1330_v7, %v1330_v7  ;;  %v1454_v8 = vld [vmem:[#allocation5 + $0xa0] sm:$0xff] }
 0x12f   :  { %v331_v15 = vrot.slane %v330_v10, 4  ;;  %v343_v16 = vadd.f32 %v342_v14, %v340_v11  ;;  %v1459_v11 = vld [vmem:[#allocation5 + $0x30] sm:$0xff] }
 0x131   :  { %v332_v17 = vadd.f32 %v331_v15, %v330_v10  ;;  %v344_v18 = vrot.slane %v343_v16, 4  ;;  %v1457_v10 = vld [vmem:[#allocation5 + $0x130] sm:$0xff]  ;;  %v1463_v15 = vld [vmem:[#allocation5 + $0x98] sm:$0xff] }
 0x133   :  { %v333_v20 = vrot.slane %v332_v17, 2  ;;  %v345_v22 = vadd.f32 %v344_v18, %v343_v16  ;;  %v1466_v16 = vld [vmem:[#allocation5 + $0x128] sm:$0xff]  ;;  %v1472_v18 = vld [vmem:[#allocation5 + $0x90] sm:$0xff] }
 0x135   :  { %v334_v23 = vadd.f32 %v333_v20, %v332_v17  ;;  %v346_v24 = vrot.slane %v345_v22, 2  ;;  %v1468_v17 = vld [vmem:[#allocation5 + $0x28] sm:$0xff]  ;;  %v1475_v20 = vld [vmem:[#allocation5 + $0x120] sm:$0xff] }
 0x137   :  { %v335_v26 = vrot.slane %v334_v23, 1  ;;  %v347_v27 = vadd.f32 %v346_v24, %v345_v22  ;;  %v1477_v22 = vld [vmem:[#allocation5 + $0x20] sm:$0xff]  ;;  %v1483_v24 = vld [vmem:[#allocation5 + $0x118] sm:$0xff] }
 0x139   :  { %v348_v33 = vrot.slane %v347_v27, 1  ;;  %v336_v37 = vadd.f32 %v335_v26, %v334_v23  ;;  %v1481_v23 = vld [vmem:[#allocation5 + $0x88] sm:$0xff]  ;;  %v1485_v26 = vld [vmem:[#allocation5 + $0x18] sm:$0xff] }
 0x13b   :  { %v349_v39 = vadd.f32 %v348_v33, %v347_v27  ;;  %v1488_v27 = vld [vmem:[#allocation5 + $0x80] sm:$0xff]  ;;  %v1490_v33 = vld [vmem:[#allocation5 + $0x110] sm:$0xff] }
 0x13d   :  { %v351_v41 = vsel %vm350_vm2, %v336_v37, %v349_v39  ;;  %v1495_v37 = vld [vmem:[#allocation5 + $0x10] sm:$0xff] }
 0x13e   :  { %368 = vmatmul.f32.vlgmr.msrb.gmra.mxu3 %v351_v41  ;;  %v1499_v41 = vld [vmem:[#allocation5 + $0x108] sm:$0xff] }
 0x13f   :  { %813 = vmatpush.msrb.mxu3 %v1261_v28  ;;  %v1362_v28 = vld [vmem:[#allocation5 + $0xf8] sm:$0xff] }
 0x140   :  { %471 = vmatpush.msra.mxu0 %v1362_v28 }
 0x141   :  { %814 = vmatpush.msrb.mxu3 %v1264_v29  ;;  %v1365_v29 = vld [vmem:[#allocation5 + $0xf0] sm:$0xff] }
 0x142   :  { %472 = vmatpush.msra.mxu0 %v1365_v29 }
 0x143   :  { %815 = vmatpush.msrb.mxu3 %v1267_v30  ;;  %v1368_v30 = vld [vmem:[#allocation5 + $0xe8] sm:$0xff] }
 0x144   :  { %473 = vmatpush.msra.mxu0 %v1368_v30 }
 0x145   :  { %816 = vmatpush.msrb.mxu3 %v1270_v31  ;;  %v1371_v31 = vld [vmem:[#allocation5 + $0x178] sm:$0xff] }
 0x146   :  { %546 = vmatpush.msrb.mxu2 %v1371_v31 }
 0x147   :  { %817 = vmatpush.msrb.mxu3 %v1273_v32  ;;  %v1373_v32 = vld [vmem:[#allocation5 + $0x78] sm:$0xff] }
 0x148   :  { %500 = vmatpush.msrb.mxu1 %v1373_v32 }
 0x149   :  { %818 = vmatpush.msrb.mxu3 %v1276_v34  ;;  %v1377_v34 = vld [vmem:[#allocation5 + $0xe0] sm:$0xff] }
 0x14a   :  { %474 = vmatpush.msra.mxu0 %v1377_v34 }
 0x14b   :  { %819 = vmatpush.msrb.mxu3 %v1279_v35  ;;  %v1380_v35 = vld [vmem:[#allocation5 + $0x170] sm:$0xff] }
 0x14c   :  { %547 = vmatpush.msrb.mxu2 %v1380_v35 }
 0x14d   :  { %820 = vmatpush.msrb.mxu3 %v1282_v36  ;;  %v1382_v36 = vld [vmem:[#allocation5 + $0x70] sm:$0xff] }
 0x14e   :  { %501 = vmatpush.msrb.mxu1 %v1382_v36 }
 0x14f   :  { %821 = vmatpush.msrb.mxu3 %v1285_v38  ;;  %v1386_v38 = vld [vmem:[#allocation5 + $0xd8] sm:$0xff] }
 0x150   :  { %475 = vmatpush.msra.mxu0 %v1386_v38 }
 0x151   :  { %822 = vmatpush.msrb.mxu3 %v1288_v40  ;;  %v1389_v40 = vld [vmem:[#allocation5 + $0x168] sm:$0xff] }
 0x152   :  { %548 = vmatpush.msrb.mxu2 %v1389_v40 }
 0x153   :  { %823 = vmatpush.msrb.mxu3 %v1291_v42  ;;  %v1391_v42 = vld [vmem:[#allocation5 + $0x68] sm:$0xff] }
 0x154   :  { %502 = vmatpush.msrb.mxu1 %v1391_v42 }
 0x155   :  { %824 = vmatpush.msrb.mxu3 %v1294_v43  ;;  %v1395_v43 = vld [vmem:[#allocation5 + $0xd0] sm:$0xff] }
 0x156   :  { %476 = vmatpush.msra.mxu0 %v1395_v43  ;;  %503 = vmatpush.msrb.mxu1 %v1400_v45 }
 0x157   :  { %825 = vmatpush.msrb.mxu3 %v1296_v44  ;;  %v1398_v44 = vld [vmem:[#allocation5 + $0x160] sm:$0xff] }
 0x158   :  { %549 = vmatpush.msrb.mxu2 %v1398_v44 }
 0x159   :  { %826 = vmatpush.msrb.mxu3 %v1299_v46  ;;  %v1404_v46 = vld [vmem:[#allocation5 + $0xc8] sm:$0xff] }
 0x15a   :  { %477 = vmatpush.msra.mxu0 %v1404_v46  ;;  %550 = vmatpush.msrb.mxu2 %v1407_v47 }
 0x15b   :  { %827 = vmatpush.msrb.mxu3 %v1302_v48  ;;  %v1409_v48 = vld [vmem:[#allocation5 + $0x58] sm:$0xff] }
 0x15c   :  { %504 = vmatpush.msrb.mxu1 %v1409_v48  ;;  %551 = vmatpush.msrb.mxu2 %v1416_v50 }
 0x15d   :  { %828 = vmatpush.msrb.mxu3 %v1305_v49  ;;  %v1413_v49 = vld [vmem:[#allocation5 + $0xc0] sm:$0xff] }
 0x15e   :  { %478 = vmatpush.msra.mxu0 %v1413_v49  ;;  %505 = vmatpush.msrb.mxu1 %v1418_v51 }
 0x15f   :  { %552 = vmatpush.msrb.mxu2 %v1427_v54 }
 0x160   :  { %479 = vmatpush.msra.mxu0 %v1422_v52  ;;  %506 = vmatpush.msrb.mxu1 %v1429_v55 }
 0x161   :  { %553 = vmatpush.msrb.mxu2 %v1438_v62 }
 0x162   :  { %480 = vmatpush.msra.mxu0 %v1435_v61  ;;  %507 = vmatpush.msrb.mxu1 %v1440_v0 }
 0x163   :  { %554 = vmatpush.msrb.mxu2 %v1447_v4 }
 0x164   :  { %481 = vmatpush.msra.mxu0 %v1444_v3  ;;  %508 = vmatpush.msrb.mxu1 %v1449_v5 }
 0x165   :  { %555 = vmatpush.msrb.mxu2 %v1457_v10 }
 0x166   :  { %482 = vmatpush.msra.mxu0 %v1454_v8  ;;  %509 = vmatpush.msrb.mxu1 %v1459_v11 }
 0x167   :  { %556 = vmatpush.msrb.mxu2 %v1466_v16 }
 0x168   :  { %483 = vmatpush.msra.mxu0 %v1463_v15  ;;  %510 = vmatpush.msrb.mxu1 %v1468_v17 }
 0x169   :  { %557 = vmatpush.msrb.mxu2 %v1475_v20 }
 0x16a   :  { %484 = vmatpush.msra.mxu0 %v1472_v18  ;;  %511 = vmatpush.msrb.mxu1 %v1477_v22 }
 0x16b   :  { %558 = vmatpush.msrb.mxu2 %v1483_v24 }
 0x16c   :  { %485 = vmatpush.msra.mxu0 %v1481_v23  ;;  %512 = vmatpush.msrb.mxu1 %v1485_v26 }
 0x16d   :  { %559 = vmatpush.msrb.mxu2 %v1490_v33 }
 0x16e   :  { %486 = vmatpush.msra.mxu0 %v1488_v27  ;;  %513 = vmatpush.msrb.mxu1 %v1495_v37 }
 0x16f   :  { %560 = vmatpush.msrb.mxu2 %v1499_v41 }
 0x170   :  { %695 = vmatpush.msrb.mxu0 %v1362_v28 }
 0x172   :  { %696 = vmatpush.msrb.mxu0 %v1365_v29 }
 0x174   :  { %697 = vmatpush.msrb.mxu0 %v1368_v30  ;;  %v1546_v30 = vld [vmem:[%s1691_s6] sm:$0x1] }
 0x176   :  { %698 = vmatpush.msrb.mxu0 %v1377_v34 }
 0x178   :  { %699 = vmatpush.msrb.mxu0 %v1386_v38 }
 0x17a   :  { %700 = vmatpush.msrb.mxu0 %v1395_v43 }
 0x17c   :  { %701 = vmatpush.msrb.mxu0 %v1404_v46 }
 0x17e   :  { %702 = vmatpush.msrb.mxu0 %v1413_v49 }
 0x180   :  { %703 = vmatpush.msrb.mxu0 %v1422_v52 }
 0x182   :  { %704 = vmatpush.msrb.mxu0 %v1435_v61 }
 0x184   :  { %705 = vmatpush.msrb.mxu0 %v1444_v3 }
 0x186   :  { %706 = vmatpush.msrb.mxu0 %v1454_v8 }
 0x188   :  { %707 = vmatpush.msrb.mxu0 %v1463_v15  ;;  %v1708_v15 = vld [vmem:[#allocation15_spill] sm:$0xff] }
 0x18a   :  { %708 = vmatpush.msrb.mxu0 %v1472_v18 }
 0x18c   :  { %709 = vmatpush.msrb.mxu0 %v1481_v23  ;;  %v1710_v23 = vld [vmem:[#allocation16_spill] sm:$0xff] }
 0x18e   :  { %710 = vmatpush.msrb.mxu0 %v1488_v27 }
 0x1c1   :  { %v1424_v53 = vpop.f32.mrf.mxu3 }
 0x1c2   :  { %v372_v60 = vmul.f32 %v1424_v53, %v1424_v53 }
 0x1c4   :  { %v374_v1 = vrot.slane %v372_v60, 7  ;;  %v1501_v60 = vld [vmem:[#allocation5 + $0x8] sm:$0xff] }
 0x1c5   :  { %514 = vmatpush.msrb.mxu1 %v1501_v60 }
 0x1c6   :  { %v376_v6 = vsub.f32 %v1424_v53, %v374_v1 }
 0x1c7   :  { %515 = vmatpush.msrb.mxu1 %v1505_v19 }
 0x1c8   :  { %v377_v14 = vadd.f32 1e-05, %v376_v6  ;;  %v1503_v6 = vld [vmem:[#allocation5 + $0x100] sm:$0xff] }
 0x1c9   :  { %561 = vmatpush.msrb.mxu2 %v1503_v6  ;;  %724 = vmatpush.msra.mxu1 %v1373_v32 }
 0x1ca   :  { %967 = vrsqrt.f32 %v377_v14  ;;  %vm384_vm4 = vweird.f32 %v377_v14 }
 0x1cb   :  { %753 = vmatpush.msra.mxu2 %v1371_v31  ;;  %725 = vmatpush.msra.mxu1 %v1382_v36 }
 0x1cd   :  { %754 = vmatpush.msra.mxu2 %v1380_v35  ;;  %726 = vmatpush.msra.mxu1 %v1391_v42 }
 0x1cf   :  { %755 = vmatpush.msra.mxu2 %v1389_v40  ;;  %727 = vmatpush.msra.mxu1 %v1400_v45 }
 0x1d0   :  { %v968_v39 = vpop.eup %967 }
 0x1d1   :  { %v379_v1 = vmul.f32 %v968_v39, %v377_v14  ;;  %vm385_vm3 = vweird.f32 %v968_v39  ;;  %756 = vmatpush.msra.mxu2 %v1398_v44  ;;  %728 = vmatpush.msra.mxu1 %v1409_v48 }
 0x1d2   :  { %vm386_vm5 = vmor %vm384_vm4, %vm385_vm3 }
 0x1d3   :  { %v380_v25 = vmul.f32 %v968_v39, %v379_v1  ;;  %757 = vmatpush.msra.mxu2 %v1407_v47  ;;  %729 = vmatpush.msra.mxu1 %v1418_v51 }
 0x1d5   :  { %v381_v12 = vmul.f32 0.5, %v380_v25  ;;  %758 = vmatpush.msra.mxu2 %v1416_v50  ;;  %730 = vmatpush.msra.mxu1 %v1429_v55 }
 0x1d7   :  { %v382_v21 = vsub.f32 1.5, %v381_v12  ;;  %v1534_v12 = vld [vmem:[%s1690_s5] sm:$0x1]  ;;  %759 = vmatpush.msra.mxu2 %v1427_v54  ;;  %731 = vmatpush.msra.mxu1 %v1440_v0 }
 0x1d9   :  { %v383_v28 = vmul.f32 %v968_v39, %v382_v21  ;;  %760 = vmatpush.msra.mxu2 %v1438_v62  ;;  %732 = vmatpush.msra.mxu1 %v1449_v5 }
 0x1db   :  { %v387_v25 = vsel %vm386_vm5, %v968_v39, %v383_v28  ;;  %761 = vmatpush.msra.mxu2 %v1447_v4  ;;  %733 = vmatpush.msra.mxu1 %v1459_v11  ;;  %v1707_v11 = vld [vmem:[#allocation17_spill] sm:$0xff] }
 0x1dc   :  { %389 = vst [vmem:[#allocation1] sm:$0xff] %v387_v25 }
 0x1dd   :  { %762 = vmatpush.msra.mxu2 %v1457_v10  ;;  %734 = vmatpush.msra.mxu1 %v1468_v17 }
 0x1df   :  { %763 = vmatpush.msra.mxu2 %v1466_v16  ;;  %735 = vmatpush.msra.mxu1 %v1477_v22 }
 0x1e1   :  { %764 = vmatpush.msra.mxu2 %v1475_v20  ;;  %736 = vmatpush.msra.mxu1 %v1485_v26  ;;  %v1709_v20 = vld [vmem:[#allocation18_spill] sm:$0xff] }
 0x1e3   :  { %v391_v21 = vld [vmem:[#allocation1 + $0x1] ss:$9 sm:$0xff]  ;;  %765 = vmatpush.msra.mxu2 %v1483_v24  ;;  %737 = vmatpush.msra.mxu1 %v1495_v37 }
 0x1e4   :  { %v393_v29 = vmul.f32 %v391_v21, %v1534_v12 }
 0x1e5   :  { %766 = vmatpush.msra.mxu2 %v1490_v33  ;;  %738 = vmatpush.msra.mxu1 %v1501_v60 }
 0x1e6   :  { %v394_v31 = vmul.f32 %v393_v29, %v1424_v53  ;;  %v397_v32 = vperm.slane %v393_v29, 0 }
 0x1e7   :  { %767 = vmatpush.msra.mxu2 %v1499_v41  ;;  %739 = vmatpush.msra.mxu1 %v1505_v19 }
 0x1e8   :  { %v395_v34 = vsub.f32 %v1546_v30, %v394_v31  ;;  %v400_v35 = vmul.f32 %v397_v32, %v1312_v56  ;;  %v402_v36 = vmul.f32 %v397_v32, %v1330_v7  ;;  %v399_v40 = vmul.f32 %v397_v32, %v1315_v57 }
 0x1e9   :  { %v401_v42 = vmul.f32 %v397_v32, %v1317_v59  ;;  %768 = vmatpush.msra.mxu2 %v1503_v6  ;;  %v1603_v32 = vld [vmem:[%s1688_s3] ss:$0 sm:$0xff] }
 0x1ea   :  { %v404_v38 = vperm.slane %v395_v34, 0 }
 0x1ec   :  { %v407_v43 = vadd.f32 %v404_v38, %v400_v35  ;;  %v409_v44 = vadd.f32 %v404_v38, %v402_v36  ;;  %v406_v56 = vadd.f32 %v404_v38, %v399_v40  ;;  %v408_v45 = vadd.f32 %v404_v38, %v401_v42 }
 0x1ee   :  { %v410_v7 = vmax.f32 %v406_v56, 0.0  ;;  %v413_v57 = vmax.f32 %v409_v44, 0.0  ;;  %v411_v46 = vmax.f32 %v407_v43, 0.0  ;;  %v412_v59 = vmax.f32 %v408_v45, 0.0 }
 0x1f0   :  { %v414_v47 = vrot.slane %v410_v7, 7  ;;  %v426_v48 = vrot.slane %v410_v7, 1  ;;  %487 = vmatmul.f32.vlgmr.msra.gmra.mxu0 %v410_v7  ;;  %v417_v49 = vrot.slane %v413_v57, 7  ;;  %v427_v50 = vrot.slane %v411_v46, 1 }
 0x1f1   :  { %v415_v55 = vrot.slane %v411_v46, 7  ;;  %v428_v61 = vrot.slane %v412_v59, 1  ;;  %v416_v5 = vrot.slane %v412_v59, 7  ;;  %v429_v8 = vrot.slane %v413_v57, 1 }
 0x1f2   :  { %v421_v51 = vsel %vm129_vm1, %v417_v49, %v414_v47  ;;  %v432_v52 = vsel %vm162_vm0, %v426_v48, %v427_v50 }
 0x1f3   :  { %v422_v53 = vmul.f32 %v421_v51, %v1233_v9  ;;  %v434_v54 = vmul.f32 %v432_v52, %v1222_v63  ;;  %v420_v62 = vsel %vm129_vm1, %v414_v47, %v415_v55  ;;  %v431_v0 = vsel %vm162_vm0, %v427_v50, %v428_v61 }
 0x1f4   :  { %v423_v3 = vmul.f32 %v420_v62, %v1238_v13  ;;  %v435_v4 = vmul.f32 %v431_v0, %v1225_v2  ;;  %v419_v19 = vsel %vm129_vm1, %v415_v55, %v416_v5  ;;  %v430_v10 = vsel %vm162_vm0, %v428_v61, %v429_v8 }
 0x1f5   :  { %516 = vmatmul.f32.vlgmr.msrb.gmra.mxu1 %v422_v53  ;;  %562 = vmatmul.f32.vlgmr.msrb.gmra.mxu2 %v434_v54  ;;  %v424_v14 = vmul.f32 %v419_v19, %v1707_v11  ;;  %v436_v16 = vmul.f32 %v430_v10, %v1708_v15  ;;  %v418_v17 = vsel %vm129_vm1, %v416_v5, %v417_v49 }
 0x1f6   :  { %v433_v18 = vsel %vm162_vm0, %v429_v8, %v426_v48  ;;  %v425_v22 = vmul.f32 %v418_v17, %v1709_v20 }
 0x1f7   :  { %v437_v24 = vmul.f32 %v433_v18, %v1710_v23 }
 0x1f8   :  { %490 = vmatmul.f32.gmra.mxu0 %v411_v46 }
 0x1fd   :  { %519 = vmatmul.f32.gmra.mxu1 %v423_v3  ;;  %565 = vmatmul.f32.gmra.mxu2 %v435_v4 }
 0x200   :  { %493 = vmatmul.f32.gmra.mxu0 %v412_v59 }
 0x205   :  { %522 = vmatmul.f32.gmra.mxu1 %v424_v14  ;;  %568 = vmatmul.f32.gmra.mxu2 %v436_v16 }
 0x208   :  { %496 = vmatmul.f32.gmra.mxu0 %v413_v57 }
 0x20d   :  { %525 = vmatmul.f32.gmra.mxu1 %v425_v22  ;;  %571 = vmatmul.f32.gmra.mxu2 %v437_v24 }
 0x26d   :  { %v488_v26 = vpop.f32.mrf.mxu0 }
 0x272   :  { %v517_v27 = vpop.f32.mrf.mxu1 }
 0x273   :  { %v518_v28 = vadd.f32 %v517_v27, %v488_v26 }
 0x275   :  { %v491_v37 = vpop.f32.mrf.mxu0 }
 0x278   :  { %v563_v33 = vpop.f32.mrf.mxu2 }
 0x279   :  { %v575_v31 = vadd.f32 %v563_v33, %v518_v28 }
 0x27a   :  { %v520_v39 = vpop.f32.mrf.mxu1 }
 0x27b   :  { %v521_v6 = vadd.f32 %v520_v39, %v491_v37  ;;  %v582_v38 = vadd.f32 %v1603_v32, %v575_v31 }
 0x27d   :  { %v494_v1 = vpop.f32.mrf.mxu0  ;;  %v595_v45 = vmul.f32 %v582_v38, %v582_v38 }
 0x280   :  { %v566_v41 = vpop.f32.mrf.mxu2 }
 0x281   :  { %v576_v25 = vadd.f32 %v566_v41, %v521_v6 }
 0x282   :  { %v523_v60 = vpop.f32.mrf.mxu1 }
 0x283   :  { %v524_v21 = vadd.f32 %v523_v60, %v494_v1  ;;  %v583_v35 = vadd.f32 %v1603_v32, %v576_v25 }
 0x285   :  { %v497_v42 = vpop.f32.mrf.mxu0  ;;  %v596_v43 = vmul.f32 %v583_v35, %v583_v35  ;;  %v586_v7 = vadd.f32 %v583_v35, %v582_v38 }
 0x287   :  { %v599_v59 = vadd.f32 %v596_v43, %v595_v45 }
 0x288   :  { %v569_v29 = vpop.f32.mrf.mxu2 }
 0x289   :  { %v577_v34 = vadd.f32 %v569_v29, %v524_v21 }
 0x28a   :  { %v526_v36 = vpop.f32.mrf.mxu1 }
 0x28b   :  { %v584_v40 = vadd.f32 %v1603_v32, %v577_v34  ;;  %v527_v44 = vadd.f32 %v526_v36, %v497_v42 }
 0x28d   :  { %v597_v57 = vmul.f32 %v584_v40, %v584_v40  ;;  %v587_v47 = vadd.f32 %v586_v7, %v584_v40 }
 0x28f   :  { %v600_v49 = vadd.f32 %v599_v59, %v597_v57 }
 0x290   :  { %v572_v56 = vpop.f32.mrf.mxu2 }
 0x291   :  { %v578_v46 = vadd.f32 %v572_v56, %v527_v44 }
 0x293   :  { %v585_v48 = vadd.f32 %v1603_v32, %v578_v46 }
 0x295   :  { %v588_v50 = vadd.f32 %v587_v47, %v585_v48  ;;  %v598_v51 = vmul.f32 %v585_v48, %v585_v48 }
 0x297   :  { %v589_v52 = vrot.slane %v588_v50, 4  ;;  %v601_v53 = vadd.f32 %v600_v49, %v598_v51 }
 0x299   :  { %v590_v54 = vadd.f32 %v589_v52, %v588_v50  ;;  %v602_v55 = vrot.slane %v601_v53, 4 }
 0x29b   :  { %v591_v61 = vrot.slane %v590_v54, 2  ;;  %v603_v62 = vadd.f32 %v602_v55, %v601_v53 }
 0x29d   :  { %v592_v0 = vadd.f32 %v591_v61, %v590_v54  ;;  %v604_v3 = vrot.slane %v603_v62, 2 }
 0x29f   :  { %v593_v4 = vrot.slane %v592_v0, 1  ;;  %v605_v5 = vadd.f32 %v604_v3, %v603_v62 }
 0x2a1   :  { %v606_v8 = vrot.slane %v605_v5, 1  ;;  %v594_v19 = vadd.f32 %v593_v4, %v592_v0 }
 0x2a3   :  { %v607_v10 = vadd.f32 %v606_v8, %v605_v5 }
 0x2a5   :  { %v608_v14 = vsel %vm350_vm2, %v594_v19, %v607_v10 }
 0x2a6   :  { %625 = vmatmul.f32.vlgmr.msra.gmra.mxu3 %v608_v14 }
 0x329   :  { %v626_v16 = vpop.f32.mrf.mxu3 }
 0x32a   :  { %v629_v17 = vmul.f32 %v626_v16, %v626_v16 }
 0x32c   :  { %v631_v18 = vrot.slane %v629_v17, 7  ;;  %v890_v17 = vld [vmem:[#allocation7 + $0x78] sm:$0xff] }
 0x32d   :  { %891 = vmatpush.msra.mxu0 %v890_v17 }
 0x32e   :  { %v633_v22 = vsub.f32 %v626_v16, %v631_v18  ;;  %v889_v18 = vld [vmem:[#allocation7 + $0x70] sm:$0xff] }
 0x32f   :  { %892 = vmatpush.msra.mxu0 %v889_v18 }
 0x330   :  { %v634_v24 = vadd.f32 1e-05, %v633_v22 }
 0x332   :  { %969 = vrsqrt.f32 %v634_v24  ;;  %vm641_vm7 = vweird.f32 %v634_v24 }
 0x338   :  { %v970_v26 = vpop.eup %969 }
 0x339   :  { %v636_v27 = vmul.f32 %v970_v26, %v634_v24  ;;  %vm642_vm6 = vweird.f32 %v970_v26 }
 0x33a   :  { %vm643_vm8 = vmor %vm641_vm7, %vm642_vm6 }
 0x33b   :  { %v637_v33 = vmul.f32 %v970_v26, %v636_v27  ;;  %v888_v27 = vld [vmem:[#allocation7 + $0x68] sm:$0xff] }
 0x33c   :  { %893 = vmatpush.msra.mxu0 %v888_v27 }
 0x33d   :  { %v638_v37 = vmul.f32 0.5, %v637_v33  ;;  %v887_v33 = vld [vmem:[#allocation7 + $0x60] sm:$0xff] }
 0x33e   :  { %894 = vmatpush.msra.mxu0 %v887_v33 }
 0x33f   :  { %v639_v39 = vsub.f32 1.5, %v638_v37 }
 0x341   :  { %v640_v41 = vmul.f32 %v970_v26, %v639_v39 }
 0x343   :  { %v644_v60 = vsel %vm643_vm8, %v970_v26, %v640_v41  ;;  %v886_v41 = vld [vmem:[#allocation7 + $0x58] sm:$0xff] }
 0x344   :  { %646 = vst [vmem:[#allocation1] sm:$0xff] %v644_v60  ;;  %895 = vmatpush.msra.mxu0 %v886_v41 }
 0x34b   :  { %v648_v1 = vld [vmem:[#allocation1 + $0x1] ss:$9 sm:$0xff] }
 0x34c   :  { %v650_v6 = vmul.f32 %v648_v1, %v1534_v12 }
 0x34e   :  { %v651_v28 = vmul.f32 %v650_v6, %v626_v16  ;;  %v654_v25 = vperm.slane %v650_v6, 0  ;;  %v885_v6 = vld [vmem:[#allocation7 + $0x50] sm:$0xff] }
 0x34f   :  { %896 = vmatpush.msra.mxu0 %v885_v6 }
 0x350   :  { %v652_v21 = vsub.f32 %v1546_v30, %v651_v28  ;;  %v657_v29 = vmul.f32 %v654_v25, %v583_v35  ;;  %v659_v31 = vmul.f32 %v654_v25, %v585_v48  ;;  %v656_v36 = vmul.f32 %v654_v25, %v582_v38 }
 0x351   :  { %v658_v42 = vmul.f32 %v654_v25, %v584_v40 }
 0x352   :  { %v661_v34 = vperm.slane %v652_v21, 0  ;;  %v884_v21 = vld [vmem:[#allocation7 + $0x48] sm:$0xff] }
 0x353   :  { %897 = vmatpush.msra.mxu0 %v884_v21 }
 0x354   :  { %v664_v43 = vadd.f32 %v661_v34, %v657_v29  ;;  %v666_v44 = vadd.f32 %v661_v34, %v659_v31  ;;  %v663_v56 = vadd.f32 %v661_v34, %v656_v36  ;;  %v665_v45 = vadd.f32 %v661_v34, %v658_v42  ;;  %v883_v36 = vld [vmem:[#allocation7 + $0x40] sm:$0xff] }
 0x355   :  { %898 = vmatpush.msra.mxu0 %v883_v36 }
 0x356   :  { %v668_v7 = vmax.f32 %v664_v43, 0.0  ;;  %v670_v57 = vmax.f32 %v666_v44, 0.0  ;;  %v667_v46 = vmax.f32 %v663_v56, 0.0  ;;  %v669_v59 = vmax.f32 %v665_v45, 0.0  ;;  %v882_v56 = vld [vmem:[#allocation7 + $0x38] sm:$0xff] }
 0x357   :  { %899 = vmatpush.msra.mxu0 %v882_v56 }
 0x358   :  { %v671_v47 = vrot.slane %v667_v46, 7  ;;  %v683_v49 = vrot.slane %v667_v46, 1  ;;  %711 = vmatmul.f32.vlgmr.msrb.gmra.mxu0 %v667_v46  ;;  %v674_v50 = vrot.slane %v670_v57, 7  ;;  %v684_v51 = vrot.slane %v668_v7, 1 }
 0x359   :  { %v672_v52 = vrot.slane %v668_v7, 7  ;;  %v685_v53 = vrot.slane %v669_v59, 1  ;;  %v673_v0 = vrot.slane %v669_v59, 7  ;;  %v686_v3 = vrot.slane %v670_v57, 1 }
 0x35a   :  { %v678_v35 = vsel %vm129_vm1, %v674_v50, %v671_v47  ;;  %v689_v38 = vsel %vm162_vm0, %v683_v49, %v684_v51 }
 0x35b   :  { %v679_v40 = vmul.f32 %v678_v35, %v1233_v9  ;;  %v691_v48 = vmul.f32 %v689_v38, %v1222_v63  ;;  %v677_v54 = vsel %vm129_vm1, %v671_v47, %v672_v52  ;;  %v688_v55 = vsel %vm162_vm0, %v684_v51, %v685_v53  ;;  %v880_v51 = vld [vmem:[#allocation7 + $0x28] sm:$0xff] }
 0x35c   :  { %v680_v61 = vmul.f32 %v677_v54, %v1238_v13  ;;  %v692_v62 = vmul.f32 %v688_v55, %v1225_v2  ;;  %v676_v63 = vsel %vm129_vm1, %v672_v52, %v673_v0  ;;  %v687_v9 = vsel %vm162_vm0, %v685_v53, %v686_v3  ;;  %v878_v54 = vld [vmem:[#allocation7 + $0x18] sm:$0xff] }
 0x35d   :  { %740 = vmatmul.f32.vlgmr.msra.gmra.mxu1 %v679_v40  ;;  %769 = vmatmul.f32.vlgmr.msra.gmra.mxu2 %v691_v48  ;;  %v681_v4 = vmul.f32 %v676_v63, %v1707_v11  ;;  %v693_v5 = vmul.f32 %v687_v9, %v1708_v15  ;;  %v675_v2 = vsel %vm129_vm1, %v673_v0, %v674_v50  ;;  %v879_v48 = vld [vmem:[#allocation7 + $0x20] sm:$0xff] }
 0x35e   :  { %v690_v13 = vsel %vm162_vm0, %v686_v3, %v683_v49  ;;  %v682_v8 = vmul.f32 %v675_v2, %v1709_v20  ;;  %v876_v3 = vld [vmem:[#allocation7 + $0x8] sm:$0xff] }
 0x35f   :  { %v694_v19 = vmul.f32 %v690_v13, %v1710_v23 }
 0x360   :  { %714 = vmatmul.f32.gmra.mxu0 %v668_v7 }
 0x365   :  { %743 = vmatmul.f32.gmra.mxu1 %v680_v61  ;;  %772 = vmatmul.f32.gmra.mxu2 %v692_v62  ;;  %v877_v62 = vld [vmem:[#allocation7 + $0x10] sm:$0xff] }
 0x368   :  { %717 = vmatmul.f32.gmra.mxu0 %v669_v59  ;;  %v881_v59 = vld [vmem:[#allocation7 + $0x30] sm:$0xff] }
 0x369   :  { %900 = vmatpush.msra.mxu0 %v881_v59 }
 0x36b   :  { %901 = vmatpush.msra.mxu0 %v880_v51 }
 0x36d   :  { %746 = vmatmul.f32.gmra.mxu1 %v681_v4  ;;  %775 = vmatmul.f32.gmra.mxu2 %v693_v5  ;;  %v875_v4 = vld [vmem:[#allocation7] sm:$0xff] }
 0x36e   :  { %902 = vmatpush.msra.mxu0 %v879_v48 }
 0x370   :  { %720 = vmatmul.f32.gmra.mxu0 %v670_v57 }
 0x371   :  { %903 = vmatpush.msra.mxu0 %v878_v54 }
 0x373   :  { %904 = vmatpush.msra.mxu0 %v877_v62 }
 0x375   :  { %749 = vmatmul.f32.gmra.mxu1 %v682_v8  ;;  %778 = vmatmul.f32.gmra.mxu2 %v694_v19  ;;  %v973_v8 = vld [vmem:[%s1685_s0] sm:$0xff] }
 0x376   :  { %905 = vmatpush.msra.mxu0 %v876_v3 }
 0x378   :  { %906 = vmatpush.msra.mxu0 %v875_v4 }
 0x379   :  { %907 = vmatmul.f32.vlgmr.msra.gmra.mxu0 %v973_v8 }
 0x3d5   :  { %v712_v10 = vpop.f32.mrf.mxu0 }
 0x3da   :  { %v741_v14 = vpop.f32.mrf.mxu1 }
 0x3db   :  { %v742_v20 = vadd.f32 %v741_v14, %v712_v10 }
 0x3dd   :  { %v715_v16 = vpop.f32.mrf.mxu0 }
 0x3e0   :  { %v770_v11 = vpop.f32.mrf.mxu2 }
 0x3e1   :  { %v782_v60 = vadd.f32 %v770_v11, %v742_v20  ;;  %v974_v11 = vld [vmem:[%s1685_s0 + $0x8] sm:$0xff] }
 0x3e2   :  { %v744_v15 = vpop.f32.mrf.mxu1  ;;  %910 = vmatmul.f32.gmra.mxu0 %v974_v11 }
 0x3e3   :  { %v745_v58 = vadd.f32 %v744_v15, %v715_v16  ;;  %v1640_v29 = vadd.f32 %v1603_v32, %v782_v60  ;;  %v975_v16 = vld [vmem:[%s1685_s0 + $0x10] sm:$0xff]  ;;  %v976_v15 = vld [vmem:[%s1685_s0 + $0x18] sm:$0xff]  ;;  %s1113_s0 = smov [#allocation10]  }
 0x3e4   :  { %s932_s30 = sshll.u32 %s1113_s0, 4  ;;  %s933_s30 = int_to_ptr.vmem [resolvable:$true] %s932_s30 }
 0x3e5   :  { %v718_v26 = vpop.f32.mrf.mxu0  ;;  %v799_v45 = vmul.f32 %v1640_v29, %v1640_v29 }
 0x3e8   :  { %v773_v22 = vpop.f32.mrf.mxu2 }
 0x3e9   :  { %v783_v37 = vadd.f32 %v773_v22, %v745_v58 }
 0x3ea   :  { %v747_v24 = vpop.f32.mrf.mxu1  ;;  %913 = vmatmul.f32.gmra.mxu0 %v975_v16 }
 0x3eb   :  { %v748_v23 = vadd.f32 %v747_v24, %v718_v26  ;;  %v1637_v28 = vadd.f32 %v1603_v32, %v783_v37 }
 0x3ed   :  { %v721_v34 = vpop.f32.mrf.mxu0  ;;  %v800_v42 = vmul.f32 %v1637_v28, %v1637_v28  ;;  %v790_v7 = vadd.f32 %v1637_v28, %v1640_v29 }
 0x3ef   :  { %v803_v47 = vadd.f32 %v800_v42, %v799_v45 }
 0x3f0   :  { %v776_v39 = vpop.f32.mrf.mxu2 }
 0x3f1   :  { %v784_v1 = vadd.f32 %v776_v39, %v748_v23 }
 0x3f2   :  { %v750_v25 = vpop.f32.mrf.mxu1  ;;  %916 = vmatmul.f32.gmra.mxu0 %v976_v15 }
 0x3f3   :  { %v1643_v31 = vadd.f32 %v1603_v32, %v784_v1  ;;  %v751_v43 = vadd.f32 %v750_v25, %v721_v34 }
 0x3f5   :  { %v801_v57 = vmul.f32 %v1643_v31, %v1643_v31  ;;  %v791_v49 = vadd.f32 %v790_v7, %v1643_v31 }
 0x3f6   :  { %v908_v27 = vpop.f32.mrf.mxu0 }
 0x3f7   :  { %v804_v35 = vadd.f32 %v803_v47, %v801_v57 }
 0x3f8   :  { %v779_v44 = vpop.f32.mrf.mxu2 }
 0x3f9   :  { %v785_v46 = vadd.f32 %v779_v44, %v751_v43 }
 0x3fb   :  { %v1655_v50 = vadd.f32 %v1603_v32, %v785_v46 }
 0x3fd   :  { %v792_v38 = vadd.f32 %v791_v49, %v1655_v50  ;;  %v802_v40 = vmul.f32 %v1655_v50, %v1655_v50 }
 0x3ff   :  { %v793_v52 = vrot.slane %v792_v38, 4  ;;  %v805_v53 = vadd.f32 %v804_v35, %v802_v40 }
 0x401   :  { %v794_v55 = vadd.f32 %v793_v52, %v792_v38  ;;  %v806_v61 = vrot.slane %v805_v53, 4 }
 0x403   :  { %v795_v32 = vrot.slane %v794_v55, 2  ;;  %v807_v0 = vadd.f32 %v806_v61, %v805_v53 }
 0x405   :  { %v796_v63 = vadd.f32 %v795_v32, %v794_v55  ;;  %v808_v9 = vrot.slane %v807_v0, 2 }
 0x407   :  { %v797_v5 = vrot.slane %v796_v63, 1  ;;  %v809_v2 = vadd.f32 %v808_v9, %v807_v0 }
 0x409   :  { %v810_v13 = vrot.slane %v809_v2, 1  ;;  %v798_v19 = vadd.f32 %v797_v5, %v796_v63 }
 0x40b   :  { %v811_v10 = vadd.f32 %v810_v13, %v809_v2 }
 0x40d   :  { %v812_v14 = vsel %vm350_vm2, %v798_v19, %v811_v10 }
 0x40e   :  { %829 = vmatmul.f32.vlgmr.msrb.gmra.mxu3 %v812_v14 }
 0x45f   :  { %v911_v41 = vpop.f32.mrf.mxu0 }
 0x467   :  { %v914_v25 = vpop.f32.mrf.mxu0 }
 0x46f   :  { %v917_v35 = vpop.f32.mrf.mxu0 }
 0x491   :  { %v830_v17 = vpop.f32.mrf.mxu3 }
 0x492   :  { %v833_v18 = vmul.f32 %v830_v17, %v830_v17 }
 0x494   :  { %v835_v22 = vrot.slane %v833_v18, 7 }
 0x496   :  { %v837_v24 = vsub.f32 %v830_v17, %v835_v22 }
 0x498   :  { %v838_v26 = vadd.f32 1e-05, %v837_v24 }
 0x49a   :  { %971 = vrsqrt.f32 %v838_v26  ;;  %vm845_vm10 = vweird.f32 %v838_v26 }
 0x4a0   :  { %v972_v58 = vpop.eup %971 }
 0x4a1   :  { %v840_v33 = vmul.f32 %v972_v58, %v838_v26  ;;  %vm846_vm9 = vweird.f32 %v972_v58 }
 0x4a2   :  { %vm847_vm11 = vmor %vm845_vm10, %vm846_vm9 }
 0x4a3   :  { %v841_v20 = vmul.f32 %v972_v58, %v840_v33 }
 0x4a5   :  { %v842_v37 = vmul.f32 0.5, %v841_v20 }
 0x4a7   :  { %v843_v23 = vsub.f32 1.5, %v842_v37 }
 0x4a9   :  { %v844_v39 = vmul.f32 %v972_v58, %v843_v23 }
 0x4ab   :  { %v848_v60 = vsel %vm847_vm11, %v972_v58, %v844_v39 }
 0x4ac   :  { %850 = vst [vmem:[#allocation1] sm:$0xff] %v848_v60 }
 0x4b3   :  { %v852_v1 = vld [vmem:[#allocation1 + $0x1] ss:$9 sm:$0xff] }
 0x4b4   :  { %v854_v6 = vmul.f32 %v852_v1, %v1534_v12 }
 0x4b6   :  { %v855_v21 = vmul.f32 %v854_v6, %v830_v17  ;;  %v858_v34 = vperm.slane %v854_v6, 0 }
 0x4b8   :  { %v856_v36 = vsub.f32 %v1546_v30, %v855_v21  ;;  %v860_v42 = vmul.f32 %v858_v34, %v1640_v29  ;;  %v861_v44 = vmul.f32 %v858_v34, %v1637_v28  ;;  %v862_v56 = vmul.f32 %v858_v34, %v1643_v31 }
 0x4b9   :  { %v863_v45 = vmul.f32 %v858_v34, %v1655_v50 }
 0x4ba   :  { %v865_v43 = vperm.slane %v856_v36, 0 }
 0x4bc   :  { %v867_v7 = vadd.f32 %v865_v43, %v860_v42  ;;  %v868_v57 = vadd.f32 %v865_v43, %v861_v44  ;;  %v869_v46 = vadd.f32 %v865_v43, %v862_v56  ;;  %v870_v59 = vadd.f32 %v865_v43, %v863_v45 }
 0x4be   :  { %v871_v47 = vmax.f32 %v867_v7, 0.0  ;;  %v872_v12 = vmax.f32 %v868_v57, 0.0  ;;  %v873_v49 = vmax.f32 %v869_v46, 0.0  ;;  %v874_v51 = vmax.f32 %v870_v59, 0.0 }
 0x4c0   :  { %v920_v38 = vadd.f32 %v908_v27, %v871_v47  ;;  %v921_v30 = vadd.f32 %v911_v41, %v872_v12  ;;  %v922_v40 = vadd.f32 %v914_v25, %v873_v49  ;;  %v923_v28 = vadd.f32 %v917_v35, %v874_v51 }
 0x4c2   :  { %924 = vst [vmem:[#allocation10] sm:$0xff] %v920_v38 }
 0x4c3   :  { %925 = vst [vmem:[#allocation10 + $0x8] sm:$0xff] %v921_v30 }
 0x4c4   :  { %926 = vst [vmem:[#allocation10 + $0x10] sm:$0xff] %v922_v40 }
 0x4c5   :  { %927 = vst [vmem:[#allocation10 + $0x18] sm:$0xff] %v923_v28 }
 0x4c6   :  { %940 = dma.vmem_to_hbm [thread:$0]  %s933_s30, 512, %s935_s12, [#allocation4], %s1106_s17, %s1106_s17, %s1107_s18  }
 0x4c7   :  { %1103 = dma.done.wait [#allocation4], 512  }
 0x4c8   :  { %1104 = vsyncadd [#allocation4], 4294966784 }
 0x4c9   :  { %945 = vsyncpa [#allocation3], 1 }
 0x4ca   :  { %946 = vsyncpa [#allocation6], 1 }
 0x4cb   :  { %947 = vsyncpa [#allocation9], 1 }
 0x4cc   :  { %948 = vsyncpa [#allocation4], 1 }

</bundles_post_ra>
